<compile_context>
chip_gen: v6e
topology: v6e:2x2x1
jax: 0.10.0
libtpu: 0.0.40
codegen_flags: <defaults>
</compile_context>

<pallas_src>
import functools

import jax
import jax.numpy as jnp
from jax import lax
from jax.experimental import pallas as pl
from jax.experimental.pallas import tpu as pltpu

STATE_DIM = 3
HIDDEN = 128
ACTION_DIM = 25            # 5 features + 10 constants + 9 operators + 1 stop
LANE = 128
N_PAD = ((ACTION_DIM + LANE - 1) // LANE) * LANE   # action axis padded to lanes
NEG_INF = -1e30


def policy_kernel(x_ref, w1_ref, b12_ref, w2_ref, w3_ref, b3_ref, o_ref, *, action_dim):
    """Fused MLP + softmax for one batch tile."""
    x = x_ref[...]                        # (TB, 3)
    w1 = w1_ref[...]                      # (3, H)
    b1 = b12_ref[0:1, :]                  # (1, H)
    b2 = b12_ref[1:2, :]                  # (1, H)

    # ---- layer 1: K=3 -> VPU broadcast multiply-adds (keeps the MXU free) ----
    h1 = (b1
          + x[:, 0:1] * w1[0:1, :]
          + x[:, 1:2] * w1[1:2, :]
          + x[:, 2:3] * w1[2:3, :])
    h1 = jnp.maximum(h1, 0.0)

    # ---- layer 2: 128x128 MXU matmul, f32 accumulation ----
    h2 = jnp.dot(h1, w2_ref[...], preferred_element_type=jnp.float32) + b2
    h2 = jnp.maximum(h2, 0.0)

    # ---- layer 3: 128 x N_PAD MXU matmul (action axis padded to 128 lanes) ----
    logits = jnp.dot(h2, w3_ref[...], preferred_element_type=jnp.float32) + b3_ref[...]

    # ---- masked softmax over the padded action lanes ----
    col = lax.broadcasted_iota(jnp.int32, logits.shape, 1)
    logits = jnp.where(col < action_dim, logits, NEG_INF)
    m = jnp.max(logits, axis=-1, keepdims=True)
    p = jnp.exp(logits - m)
    probs = p / jnp.sum(p, axis=-1, keepdims=True)
    o_ref[...] = probs.astype(o_ref.dtype)


def policy_network_forward(x, params, *, tile_b=256):
    """Linear(3,128)->ReLU->Linear(128,128)->ReLU->Linear(128,A)->Softmax."""
    w1, b1, w2, b2, w3, b3 = params
    B = x.shape[0]
    action_dim = w3.shape[1]

    # Pack the two hidden biases into one ref (fewer DMA descriptors).
    b12 = jnp.concatenate([b1.reshape(1, HIDDEN), b2.reshape(1, HIDDEN)], axis=0)
    # Pad the output layer to a full 128-lane width (lane-dense stores).
    w3p = jnp.pad(w3, ((0, 0), (0, N_PAD - action_dim)))
    b3p = jnp.pad(b3.reshape(1, action_dim), ((0, 0), (0, N_PAD - action_dim)))

    # Pad the batch to a multiple of the batch tile; slice back afterwards.
    b_pad = ((B + tile_b - 1) // tile_b) * tile_b
    xp = jnp.pad(x, ((0, b_pad - B), (0, 0)))
    grid = (b_pad // tile_b,)

    flops = 2 * b_pad * (STATE_DIM * HIDDEN + HIDDEN * HIDDEN + HIDDEN * N_PAD)
    bytes_accessed = 4 * (b_pad * STATE_DIM + STATE_DIM * HIDDEN + 2 * HIDDEN
                          + HIDDEN * HIDDEN + HIDDEN * N_PAD + N_PAD + b_pad * N_PAD)
    cost = pl.CostEstimate(flops=flops,
                           transcendentals=b_pad * N_PAD,
                           bytes_accessed=bytes_accessed)

    # Weights/biases: resident in VMEM across all grid steps (constant index_map).
    const = lambda shape: pl.BlockSpec(shape, lambda i: tuple(0 for _ in shape))

    out_padded = pl.pallas_call(
        functools.partial(policy_kernel, action_dim=action_dim),
        out_shape=jax.ShapeDtypeStruct((b_pad, N_PAD), jnp.float32),
        grid=grid,
        in_specs=[
            pl.BlockSpec((tile_b, STATE_DIM), lambda i: (i, 0)),   # x: streamed per tile
            const((STATE_DIM, HIDDEN)),                            # w1
            const((2, HIDDEN)),                                    # b1 | b2
            const((HIDDEN, HIDDEN)),                               # w2
            const((HIDDEN, N_PAD)),                                # w3 (padded)
            const((1, N_PAD)),                                     # b3 (padded)
        ],
        out_specs=pl.BlockSpec((tile_b, N_PAD), lambda i: (i, 0)),
        compiler_params=pltpu.CompilerParams(
            dimension_semantics=("parallel",)),   # v7x: split batch tiles across 2 TCs
        cost_estimate=cost,
    )(xp, w1, b12, w2, w3p, b3p)

    return out_padded[:B, :action_dim]


def init_params(key, state_dim=STATE_DIM, hidden=HIDDEN, action_dim=ACTION_DIM):
    # Mimic nn.Linear default init: uniform(-1/sqrt(fan_in), 1/sqrt(fan_in)).
    def linear(key, fan_in, fan_out):
        kw, kb = jax.random.split(key)
        bound = 1.0 / jnp.sqrt(jnp.float32(fan_in))
        w = jax.random.uniform(kw, (fan_in, fan_out), jnp.float32, -bound, bound)
        b = jax.random.uniform(kb, (fan_out,), jnp.float32, -bound, bound)
        return w, b

    k1, k2, k3 = jax.random.split(key, 3)
    w1, b1 = linear(k1, state_dim, hidden)
    w2, b2 = linear(k2, hidden, hidden)
    w3, b3 = linear(k3, hidden, action_dim)
    return (w1, b1, w2, b2, w3, b3)


def reference_forward(x, params):
    w1, b1, w2, b2, w3, b3 = params
    hp = jax.lax.Precision.HIGHEST
    h1 = jnp.maximum(jnp.dot(x, w1, precision=hp) + b1, 0.0)
    h2 = jnp.maximum(jnp.dot(h1, w2, precision=hp) + b2, 0.0)
    logits = jnp.dot(h2, w3, precision=hp) + b3
    return jax.nn.softmax(logits, axis=-1)


if __name__ == "__main__":
    key = jax.random.PRNGKey(0)
    kp, kx = jax.random.split(key)
    params = init_params(kp)

    batch = 8
    x = jax.random.normal(kx, (batch, STATE_DIM), jnp.float32)

    out = policy_network_forward(x, params)
    out = jax.block_until_ready(out)

    ref = reference_forward(x, params)
    assert out.shape == (batch, ACTION_DIM)
    assert bool(jnp.allclose(jnp.sum(out, axis=-1), 1.0, atol=1e-5))
    assert bool(jnp.allclose(out, ref, atol=1e-5, rtol=1e-5))

    print("KERNEL_OK")
</pallas_src>

<mosaic_0001>
module attributes {stable_mosaic.version = 11 : i64} {
  func.func @policy_kernel(%arg0: i32, %arg1: memref<256x3xf32, #tpu.memory_space<vmem>>, %arg2: memref<3x128xf32, #tpu.memory_space<vmem>>, %arg3: memref<2x128xf32, #tpu.memory_space<vmem>>, %arg4: memref<128x128xf32, #tpu.memory_space<vmem>>, %arg5: memref<128x128xf32, #tpu.memory_space<vmem>>, %arg6: memref<1x128xf32, #tpu.memory_space<vmem>>, %arg7: memref<256x128xf32, #tpu.memory_space<vmem>>) attributes {dimension_semantics = [#tpu.dimension_semantics<parallel>], iteration_bounds = array<i64: 1>, scalar_prefetch = 0 : i64, scratch_operands = 0 : i64, tpu.core_type = #tpu.core_type<tc>, window_params = [{transform_indices = @transform_0, window_bounds = array<i64: 256, 3>}, {pipeline_mode = #tpu.pipeline_mode<synchronous>, transform_indices = @transform_1, window_bounds = array<i64: 3, 128>}, {pipeline_mode = #tpu.pipeline_mode<synchronous>, transform_indices = @transform_2, window_bounds = array<i64: 2, 128>}, {pipeline_mode = #tpu.pipeline_mode<synchronous>, transform_indices = @transform_3, window_bounds = array<i64: 128, 128>}, {pipeline_mode = #tpu.pipeline_mode<synchronous>, transform_indices = @transform_4, window_bounds = array<i64: 128, 128>}, {pipeline_mode = #tpu.pipeline_mode<synchronous>, transform_indices = @transform_5, window_bounds = array<i64: 1, 128>}, {transform_indices = @transform_6, window_bounds = array<i64: 256, 128>}]} {
    %c0 = arith.constant 0 : index
    %c0_0 = arith.constant 0 : index
    %0 = vector.load %arg1[%c0, %c0_0] : memref<256x3xf32, #tpu.memory_space<vmem>>, vector<256x3xf32>
    %c0_1 = arith.constant 0 : index
    %c0_2 = arith.constant 0 : index
    %1 = vector.load %arg2[%c0_1, %c0_2] : memref<3x128xf32, #tpu.memory_space<vmem>>, vector<3x128xf32>
    %c0_3 = arith.constant 0 : index
    %c0_4 = arith.constant 0 : index
    %2 = vector.load %arg3[%c0_3, %c0_4] : memref<2x128xf32, #tpu.memory_space<vmem>>, vector<1x128xf32>
    %c1 = arith.constant 1 : index
    %c0_5 = arith.constant 0 : index
    %3 = vector.load %arg3[%c1, %c0_5] : memref<2x128xf32, #tpu.memory_space<vmem>>, vector<1x128xf32>
    %4 = vector.extract_strided_slice %0 {offsets = [0, 0], sizes = [256, 1], strides = [1, 1]} : vector<256x3xf32> to vector<256x1xf32>
    %5 = vector.extract_strided_slice %1 {offsets = [0, 0], sizes = [1, 128], strides = [1, 1]} : vector<3x128xf32> to vector<1x128xf32>
    %6 = vector.broadcast %4 : vector<256x1xf32> to vector<256x128xf32>
    %7 = vector.broadcast %5 : vector<1x128xf32> to vector<256x128xf32>
    %8 = arith.mulf %6, %7 : vector<256x128xf32>
    %9 = vector.broadcast %2 : vector<1x128xf32> to vector<256x128xf32>
    %10 = arith.addf %9, %8 : vector<256x128xf32>
    %11 = vector.extract_strided_slice %0 {offsets = [0, 1], sizes = [256, 1], strides = [1, 1]} : vector<256x3xf32> to vector<256x1xf32>
    %12 = vector.extract_strided_slice %1 {offsets = [1, 0], sizes = [1, 128], strides = [1, 1]} : vector<3x128xf32> to vector<1x128xf32>
    %13 = vector.broadcast %11 : vector<256x1xf32> to vector<256x128xf32>
    %14 = vector.broadcast %12 : vector<1x128xf32> to vector<256x128xf32>
    %15 = arith.mulf %13, %14 : vector<256x128xf32>
    %16 = arith.addf %10, %15 : vector<256x128xf32>
    %17 = vector.extract_strided_slice %0 {offsets = [0, 2], sizes = [256, 1], strides = [1, 1]} : vector<256x3xf32> to vector<256x1xf32>
    %18 = vector.extract_strided_slice %1 {offsets = [2, 0], sizes = [1, 128], strides = [1, 1]} : vector<3x128xf32> to vector<1x128xf32>
    %19 = vector.broadcast %17 : vector<256x1xf32> to vector<256x128xf32>
    %20 = vector.broadcast %18 : vector<1x128xf32> to vector<256x128xf32>
    %21 = arith.mulf %19, %20 : vector<256x128xf32>
    %22 = arith.addf %16, %21 : vector<256x128xf32>
    %cst = arith.constant 0.000000e+00 : f32
    %23 = vector.broadcast %cst : f32 to vector<256x128xf32>
    %24 = arith.maximumf %22, %23 : vector<256x128xf32>
    %c0_6 = arith.constant 0 : index
    %c0_7 = arith.constant 0 : index
    %25 = vector.load %arg4[%c0_6, %c0_7] : memref<128x128xf32, #tpu.memory_space<vmem>>, vector<128x128xf32>
    %cst_8 = arith.constant dense<0.000000e+00> : vector<256x128xf32>
    %26 = tpu.matmul %24, %25, %cst_8 {dimension_numbers = #tpu.dot_dimension_numbers<[1], [0], [0], [1], [0, 0, 1, 1], [], []>} : vector<256x128xf32>, vector<128x128xf32>, vector<256x128xf32> -> vector<256x128xf32>
    %27 = vector.broadcast %3 : vector<1x128xf32> to vector<256x128xf32>
    %28 = arith.addf %26, %27 : vector<256x128xf32>
    %cst_9 = arith.constant 0.000000e+00 : f32
    %29 = vector.broadcast %cst_9 : f32 to vector<256x128xf32>
    %30 = arith.maximumf %28, %29 : vector<256x128xf32>
    %c0_10 = arith.constant 0 : index
    %c0_11 = arith.constant 0 : index
    %31 = vector.load %arg5[%c0_10, %c0_11] : memref<128x128xf32, #tpu.memory_space<vmem>>, vector<128x128xf32>
    %cst_12 = arith.constant dense<0.000000e+00> : vector<256x128xf32>
    %32 = tpu.matmul %30, %31, %cst_12 {dimension_numbers = #tpu.dot_dimension_numbers<[1], [0], [0], [1], [0, 0, 1, 1], [], []>} : vector<256x128xf32>, vector<128x128xf32>, vector<256x128xf32> -> vector<256x128xf32>
    %c0_13 = arith.constant 0 : index
    %c0_14 = arith.constant 0 : index
    %33 = vector.load %arg6[%c0_13, %c0_14] : memref<1x128xf32, #tpu.memory_space<vmem>>, vector<1x128xf32>
    %34 = vector.broadcast %33 : vector<1x128xf32> to vector<256x128xf32>
    %35 = arith.addf %32, %34 : vector<256x128xf32>
    %36 = tpu.iota {dimensions = array<i32: 1>} : vector<256x128xi32>
    %c25_i32 = arith.constant 25 : i32
    %37 = vector.broadcast %c25_i32 : i32 to vector<256x128xi32>
    %38 = arith.cmpi slt, %36, %37 : vector<256x128xi32>
    %cst_15 = arith.constant -1.000000e+30 : f32
    %39 = vector.broadcast %cst_15 : f32 to vector<256x128xf32>
    %40 = arith.select %38, %35, %39 : vector<256x128xi1>, vector<256x128xf32>
    %cst_16 = arith.constant dense<0xFF800000> : vector<256xf32>
    %41 = vector.multi_reduction <maximumf>, %40, %cst_16 [1] : vector<256x128xf32> to vector<256xf32>
    %42 = vector.shape_cast %41 : vector<256xf32> to vector<256x1xf32>
    %43 = vector.broadcast %42 : vector<256x1xf32> to vector<256x128xf32>
    %44 = arith.subf %40, %43 : vector<256x128xf32>
    %45 = math.exp %44 : vector<256x128xf32>
    %cst_17 = arith.constant dense<0.000000e+00> : vector<256xf32>
    %46 = vector.multi_reduction <add>, %45, %cst_17 [1] : vector<256x128xf32> to vector<256xf32>
    %47 = vector.shape_cast %46 : vector<256xf32> to vector<256x1xf32>
    %48 = vector.broadcast %47 : vector<256x1xf32> to vector<256x128xf32>
    %49 = arith.divf %45, %48 : vector<256x128xf32>
    %c0_18 = arith.constant 0 : index
    %c0_19 = arith.constant 0 : index
    %50 = vector.load %arg7[%c0_18, %c0_19] : memref<256x128xf32, #tpu.memory_space<vmem>>, vector<256x128xf32>
    tpu.vector_store %arg7[%c0_18, %c0_19], %49 {strides = array<i32>} : memref<256x128xf32, #tpu.memory_space<vmem>>, vector<256x128xf32>,
    return
  }
  func.func @transform_0(%arg0: i32) -> (i32, i32) {
    %c0_i32 = arith.constant 0 : i32
    %c0_i32_0 = arith.constant 0 : i32
    return %arg0, %c0_i32 : i32, i32
  }
  func.func @transform_1(%arg0: i32) -> (i32, i32) {
    %c0_i32 = arith.constant 0 : i32
    %c0_i32_0 = arith.constant 0 : i32
    %c0_i32_1 = arith.constant 0 : i32
    return %c0_i32, %c0_i32_0 : i32, i32
  }
  func.func @transform_2(%arg0: i32) -> (i32, i32) {
    %c0_i32 = arith.constant 0 : i32
    %c0_i32_0 = arith.constant 0 : i32
    %c0_i32_1 = arith.constant 0 : i32
    return %c0_i32, %c0_i32_0 : i32, i32
  }
  func.func @transform_3(%arg0: i32) -> (i32, i32) {
    %c0_i32 = arith.constant 0 : i32
    %c0_i32_0 = arith.constant 0 : i32
    %c0_i32_1 = arith.constant 0 : i32
    return %c0_i32, %c0_i32_0 : i32, i32
  }
  func.func @transform_4(%arg0: i32) -> (i32, i32) {
    %c0_i32 = arith.constant 0 : i32
    %c0_i32_0 = arith.constant 0 : i32
    %c0_i32_1 = arith.constant 0 : i32
    return %c0_i32, %c0_i32_0 : i32, i32
  }
  func.func @transform_5(%arg0: i32) -> (i32, i32) {
    %c0_i32 = arith.constant 0 : i32
    %c0_i32_0 = arith.constant 0 : i32
    %c0_i32_1 = arith.constant 0 : i32
    return %c0_i32, %c0_i32_0 : i32, i32
  }
  func.func @transform_6(%arg0: i32) -> (i32, i32) {
    %c0_i32 = arith.constant 0 : i32
    %c0_i32_0 = arith.constant 0 : i32
    return %arg0, %c0_i32 : i32, i32
  }
}

</mosaic_0001>

<bundles_post_ra>
// kernel: tpu_custom_call.1
= control target key start
LH: loop header
LB: loop body
LE: loop exit
PB: predicated region body
PF: predicated region fallthrough
CT: control target
= control target key end

     0   :  { %v2076_v1 = vmov 1   ;;  %v2077_v2 = vmov 0   ;;  %v2078_v7 = vmov 2   ;;  %s3066_s0 = inlined_call_operand.vmem [shape: f32[256,3], index: 0, kind: input, shape index: {}]   ;;  %s3067_s1 = inlined_call_operand.vmem [shape: f32[3,128], index: 1, kind: input, shape index: {}]   ;;  %s3068_s2 = inlined_call_operand.vmem [shape: f32[2,128], index: 2, kind: input, shape index: {}]   ;;  %s3069_s3 = inlined_call_operand.vmem [shape: f32[128,128], index: 3, kind: input, shape index: {}]   ;;  %s3070_s4 = inlined_call_operand.vmem [shape: f32[128,128], index: 4, kind: input, shape index: {}]   ;;  %s3071_s5 = inlined_call_operand.vmem [shape: f32[1,128], index: 5, kind: input, shape index: {}]   ;;  %s3072_s6 = inlined_call_operand.hbm [shape: f32[256,128], index: 6, kind: output, shape index: {}]  }
   0x1   :  { %v24_v0 = vld [vmem:[%s3066_s0] sm:$0xff]  ;;  %1877 = vset.pattern.permute.xlu1 %v2076_v1  ;;  %1876 = vset.pattern.permute.xlu0 %v2077_v2  ;;  %v25_v3 = vld [vmem:[%s3066_s0 + $0x8] sm:$0xff]  ;;  %v2128_v4 = vld [vmem:[%s3066_s0 + $0x10] sm:$0xff] }
   0x2   :  { %292 = vperm.xlu1 %1877, %v24_v0   ;;  %61 = vperm.xlu0 %1876, %v24_v0   ;;  %v730_v5 = vld [vmem:[%s3069_s3 + $0x78] sm:$0xff]  ;;  %v729_v6 = vld [vmem:[%s3069_s3 + $0x70] sm:$0xff]  ;;  %v728_v8 = vld [vmem:[%s3069_s3 + $0x68] sm:$0xff] }
   0x3   :  { %1710 = vmatprep.subr.mxu0 %v730_v5  ;;  %v27_v9 = vld [vmem:[%s3066_s0 + $0x18] sm:$0xff]  ;;  %v727_v10 = vld [vmem:[%s3069_s3 + $0x60] sm:$0xff] }
   0x4   :  { %1711 = vmatpush3.msra.mxu0 %v730_v5  ;;  %v726_v11 = vld [vmem:[%s3069_s3 + $0x58] sm:$0xff] }
   0x5   :  { %1712 = vmatprep.subr.mxu0 %v729_v6 }
   0x6   :  { %296 = vperm.xlu1 %1877, %v25_v3   ;;  %66 = vperm.xlu0 %1876, %v25_v3  }
   0x7   :  { %1713 = vmatpush3.msra.mxu0 %v729_v6 }
   0x8   :  { %1714 = vmatprep.subr.mxu0 %v728_v8 }
   0x9   :  { %1715 = vmatpush3.msra.mxu0 %v728_v8 }
   0xa   :  { %1878 = vset.pattern.permute.xlu1 %v2078_v7  ;;  %71 = vperm.xlu0 %1876, %v2128_v4  }
   0xb   :  { %488 = vperm.xlu1 %1878, %v24_v0  }
   0xe   :  { %76 = vperm.xlu0 %1876, %v27_v9  }
   0xf   :  { %11 = vsyncpa [#allocation3], 0  ;;  %492 = vperm.xlu1 %1878, %v25_v3   ;;  %1716 = vmatprep.subr.mxu0 %v727_v10  ;;  %v725_v12 = vld [vmem:[%s3069_s3 + $0x50] sm:$0xff]  ;;  %v724_v13 = vld [vmem:[%s3069_s3 + $0x48] sm:$0xff]  ;;  %v219_v41 = vlaneseq }
  0x10   :  { %1717 = vmatpush3.msra.mxu0 %v727_v10  ;;  %v2162_v14 = vld [vmem:[%s3066_s0 + $0x20] sm:$0xff]  ;;  %v722_v16 = vld [vmem:[%s3069_s3 + $0x38] sm:$0xff]  ;;  %v2175_v17 = vld [vmem:[%s3066_s0 + $0x30] sm:$0xff] }
  0x11   :  { %1718 = vmatprep.subr.mxu0 %v726_v11  ;;  %v723_v15 = vld [vmem:[%s3069_s3 + $0x40] sm:$0xff]  ;;  %v721_v18 = vld [vmem:[%s3069_s3 + $0x30] sm:$0xff]  ;;  %v29_v19 = vld [vmem:[%s3066_s0 + $0x28] sm:$0xff]  ;;  %v220_v42 = vshrl.u32 %v219_v41, 7 }
  0x12   :  { %1881 = vset.pattern.permute.xlu0 %v2078_v7  ;;  %1719 = vmatpush3.msra.mxu0 %v726_v11  ;;  %v720_v20 = vld [vmem:[%s3069_s3 + $0x28] sm:$0xff]  ;;  %v2191_v21 = vld [vmem:[%s3066_s0 + $0x40] sm:$0xff]  ;;  %v718_v23 = vld [vmem:[%s3069_s3 + $0x18] sm:$0xff] }
  0x13   :  { %1879 = vset.pattern.permute.xlu1 %v2076_v1  ;;  %496 = vperm.xlu0 %1881, %v2128_v4   ;;  %v719_v22 = vld [vmem:[%s3069_s3 + $0x20] sm:$0xff]  ;;  %v2203_v24 = vld [vmem:[%s3066_s0 + $0x50] sm:$0xff]  ;;  %v716_v26 = vld [vmem:[%s3069_s3 + $0x8] sm:$0xff]  ;;  %v221_v43 = vsub.s32 0, %v220_v42  ;;  %v421_v47 = vsub.s32 1, %v220_v42  ;;  %v617_v51 = vsub.s32 2, %v220_v42 }
  0x14   :  { %304 = vperm.xlu1 %1879, %v27_v9   ;;  %1720 = vmatprep.subr.mxu0 %v725_v12  ;;  %v717_v25 = vld [vmem:[%s3069_s3 + $0x10] sm:$0xff]  ;;  %v36_v27 = vld [vmem:[%s3066_s0 + $0x60] sm:$0xff]  ;;  %v31_v31 = vld [vmem:[%s3066_s0 + $0x38] sm:$0xff] }
  0x15   :  { %1721 = vmatpush3.msra.mxu0 %v725_v12  ;;  %v715_v28 = vld [vmem:[%s3069_s3] sm:$0xff]  ;;  %v2223_v29 = vld [vmem:[%s3066_s0 + $0x70] sm:$0xff]  ;;  %v33_v36 = vld [vmem:[%s3066_s0 + $0x48] sm:$0xff] }
  0x16   :  { %1722 = vmatprep.subr.mxu0 %v724_v13  ;;  %v2231_v30 = vld [vmem:[%s3066_s0 + $0x80] sm:$0xff]  ;;  %v2240_v32 = vld [vmem:[%s3066_s0 + $0x90] sm:$0xff]  ;;  %v35_v39 = vld [vmem:[%s3066_s0 + $0x58] sm:$0xff] }
  0x17   :  { %504 = vperm.xlu0 %1881, %v2162_v14   ;;  %1723 = vmatpush3.msra.mxu0 %v724_v13  ;;  %v2247_v33 = vld [vmem:[%s3066_s0 + $0xa0] sm:$0xff]  ;;  %v2253_v34 = vld [vmem:[%s3066_s0 + $0xb0] sm:$0xff]  ;;  %v37_v40 = vld [vmem:[%s3066_s0 + $0x68] sm:$0xff] }
  0x18   :  { %1880 = vset.pattern.permute.xlu1 %v2077_v2  ;;  %1724 = vmatprep.subr.mxu0 %v723_v15  ;;  %v2260_v35 = vld [vmem:[%s3066_s0 + $0xc0] sm:$0xff]  ;;  %v2271_v37 = vld [vmem:[%s3066_s0 + $0xd0] sm:$0xff]  ;;  %v39_v45 = vld [vmem:[%s3066_s0 + $0x78] sm:$0xff] }
  0x19   :  { %81 = vperm.xlu1 %1880, %v2162_v14   ;;  %1725 = vmatpush3.msra.mxu0 %v723_v15  ;;  %v2277_v38 = vld [vmem:[%s3066_s0 + $0xe0] sm:$0xff]  ;;  %v2332_v56 = vld [vmem:[%s3066_s0 + $0xf0] sm:$0xff]  ;;  %v41_v12 = vld [vmem:[%s3066_s0 + $0x88] sm:$0xff] }
  0x1a   :  { %1726 = vmatprep.subr.mxu0 %v722_v16  ;;  %v56_v44 = vld [vmem:[%s3067_s1] sm:$0x7] }
  0x1b   :  { %512 = vperm.xlu0 %1881, %v2175_v17   ;;  %1727 = vmatpush3.msra.mxu0 %v722_v16  ;;  %v2316_v46 = vrot.slane %v56_v44, %v221_v43  ;;  %v2323_v52 = vld [vmem:[%s3068_s2] ss:$0 sm:$0xff]  ;;  %v2327_v53 = vrot.slane %v56_v44, %v421_v47  ;;  %v2336_v59 = vrot.slane %v56_v44, %v617_v51  ;;  %v1007_v44 = vld [vmem:[%s3070_s4 + $0x78] sm:$0xff]  ;;  %v1006_v47 = vld [vmem:[%s3070_s4 + $0x70] sm:$0xff] }
  0x1c   :  { %1728 = vmatprep.subr.mxu0 %v721_v18  ;;  %1790 = vmatprep.subr.mxu1 %v1007_v44 }
  0x1d   :  { %86 = vperm.xlu1 %1880, %v29_v19   ;;  %1729 = vmatpush3.msra.mxu0 %v721_v18  ;;  %v2364_v18 = vld [vmem:[%s3066_s0 + $0xf8] sm:$0xff] }
  0x1e   :  { %1730 = vmatprep.subr.mxu0 %v720_v20  ;;  %1791 = vmatpush3.msra.mxu1 %v1007_v44 }
  0x1f   :  { %520 = vperm.xlu0 %1881, %v2191_v21   ;;  %1731 = vmatpush3.msra.mxu0 %v720_v20 }
  0x20   :  { %1732 = vmatprep.subr.mxu0 %v719_v22  ;;  %1792 = vmatprep.subr.mxu1 %v1006_v47 }
  0x21   :  { %1882 = vset.pattern.permute.xlu1 %v2078_v7  ;;  %1733 = vmatpush3.msra.mxu0 %v719_v22 }
  0x22   :  { %500 = vperm.xlu1 %1882, %v27_v9   ;;  %1734 = vmatprep.subr.mxu0 %v718_v23 }
  0x23   :  { %528 = vperm.xlu0 %1881, %v2203_v24   ;;  %1735 = vmatpush3.msra.mxu0 %v718_v23 }
  0x24   :  { %1736 = vmatprep.subr.mxu0 %v717_v25  ;;  %1793 = vmatpush3.msra.mxu1 %v1006_v47 }
  0x25   :  { %1737 = vmatpush3.msra.mxu0 %v717_v25  ;;  %v43_v25 = vld [vmem:[%s3066_s0 + $0x98] sm:$0xff] }
  0x26   :  { %1883 = vset.pattern.permute.xlu1 %v2076_v1  ;;  %1738 = vmatprep.subr.mxu0 %v716_v26 }
  0x27   :  { %312 = vperm.xlu1 %1883, %v29_v19   ;;  %536 = vperm.xlu0 %1881, %v36_v27  }
  0x28   :  { %1739 = vmatpush3.msra.mxu0 %v716_v26 }
  0x29   :  { %1740 = vmatprep.subr.mxu0 %v715_v28 }
  0x2a   :  { %1741 = vmatpush3.msra.mxu0 %v715_v28 }
  0x2b   :  { %1884 = vset.pattern.permute.xlu1 %v2077_v2  ;;  %544 = vperm.xlu0 %1881, %v2223_v29  }
  0x2c   :  { %91 = vperm.xlu1 %1884, %v2175_v17  }
  0x2f   :  { %552 = vperm.xlu0 %1881, %v2231_v30  }
  0x30   :  { %96 = vperm.xlu1 %1884, %v31_v31  }
  0x33   :  { %560 = vperm.xlu0 %1881, %v2240_v32  }
  0x34   :  { %1885 = vset.pattern.permute.xlu1 %v2078_v7 }
  0x35   :  { %508 = vperm.xlu1 %1885, %v29_v19  }
  0x37   :  { %568 = vperm.xlu0 %1881, %v2247_v33  }
  0x39   :  { %1886 = vset.pattern.permute.xlu1 %v2076_v1 }
  0x3a   :  { %320 = vperm.xlu1 %1886, %v31_v31  }
  0x3b   :  { %576 = vperm.xlu0 %1881, %v2253_v34  }
  0x3e   :  { %1887 = vset.pattern.permute.xlu1 %v2077_v2 }
  0x3f   :  { %101 = vperm.xlu1 %1887, %v2191_v21   ;;  %584 = vperm.xlu0 %1881, %v2260_v35  }
  0x43   :  { %106 = vperm.xlu1 %1887, %v33_v36   ;;  %592 = vperm.xlu0 %1881, %v2271_v37  }
  0x47   :  { %1888 = vset.pattern.permute.xlu1 %v2078_v7  ;;  %600 = vperm.xlu0 %1881, %v2277_v38  }
  0x48   :  { %516 = vperm.xlu1 %1888, %v31_v31  }
  0x4b   :  { %1921 = vset.pattern.permute.xlu0 %v2076_v1 }
  0x4c   :  { %1889 = vset.pattern.permute.xlu1 %v2076_v1  ;;  %300 = vperm.xlu0 %1921, %v2128_v4  }
  0x4d   :  { %328 = vperm.xlu1 %1889, %v33_v36  }
  0x50   :  { %308 = vperm.xlu0 %1921, %v2162_v14  }
  0x51   :  { %1890 = vset.pattern.permute.xlu1 %v2077_v2 }
  0x52   :  { %111 = vperm.xlu1 %1890, %v2203_v24  }
  0x54   :  { %316 = vperm.xlu0 %1921, %v2175_v17  }
  0x56   :  { %116 = vperm.xlu1 %1890, %v35_v39  }
  0x58   :  { %324 = vperm.xlu0 %1921, %v2191_v21  }
  0x5a   :  { %1891 = vset.pattern.permute.xlu1 %v2078_v7 }
  0x5b   :  { %524 = vperm.xlu1 %1891, %v33_v36  }
  0x5c   :  { %332 = vperm.xlu0 %1921, %v2203_v24  }
  0x5f   :  { %1892 = vset.pattern.permute.xlu1 %v2076_v1 }
  0x60   :  { %336 = vperm.xlu1 %1892, %v35_v39   ;;  %340 = vperm.xlu0 %1921, %v36_v27  }
  0x64   :  { %1893 = vset.pattern.permute.xlu1 %v2077_v2  ;;  %348 = vperm.xlu0 %1921, %v2223_v29  }
  0x65   :  { %121 = vperm.xlu1 %1893, %v36_v27  }
  0x68   :  { %356 = vperm.xlu0 %1921, %v2231_v30  }
  0x69   :  { %126 = vperm.xlu1 %1893, %v37_v40  }
  0x6c   :  { %364 = vperm.xlu0 %1921, %v2240_v32  }
  0x6d   :  { %1894 = vset.pattern.permute.xlu1 %v2078_v7 }
  0x6e   :  { %532 = vperm.xlu1 %1894, %v35_v39  }
  0x70   :  { %372 = vperm.xlu0 %1921, %v2247_v33  }
  0x72   :  { %1895 = vset.pattern.permute.xlu1 %v2076_v1 }
  0x73   :  { %344 = vperm.xlu1 %1895, %v37_v40  }
  0x74   :  { %380 = vperm.xlu0 %1921, %v2253_v34  }
  0x77   :  { %1896 = vset.pattern.permute.xlu1 %v2077_v2 }
  0x78   :  { %131 = vperm.xlu1 %1896, %v2223_v29   ;;  %388 = vperm.xlu0 %1921, %v2260_v35  }
  0x7c   :  { %136 = vperm.xlu1 %1896, %v39_v45   ;;  %396 = vperm.xlu0 %1921, %v2271_v37  }
  0x7d   :  { %v293_v48 = vpop.permute.xlu1 %292  ;;  %v62_v49 = vpop.permute.xlu0 %61 }
  0x7e   :  { %v223_v50 = vmul.f32 %v2316_v46, %v62_v49  ;;  %v423_v60 = vmul.f32 %v2327_v53, %v293_v48  ;;  %v1005_v48 = vld [vmem:[%s3070_s4 + $0x68] sm:$0xff]  ;;  %v1004_v49 = vld [vmem:[%s3070_s4 + $0x60] sm:$0xff] }
  0x7f   :  { %1794 = vmatprep.subr.mxu1 %v1005_v48 }
  0x80   :  { %1897 = vset.pattern.permute.xlu1 %v2078_v7  ;;  %404 = vperm.xlu0 %1921, %v2277_v38   ;;  %v259_v57 = vadd.f32 %v2323_v52, %v223_v50 }
  0x81   :  { %540 = vperm.xlu1 %1897, %v37_v40   ;;  %v297_v54 = vpop.permute.xlu1 %296  ;;  %v67_v55 = vpop.permute.xlu0 %66  ;;  %v2409_v40 = vld [vmem:[%s3066_s0 + $0xa8] sm:$0xff]  ;;  %1795 = vmatpush3.msra.mxu1 %v1005_v48 }
  0x82   :  { %v224_v58 = vmul.f32 %v2316_v46, %v67_v55  ;;  %v455_v3 = vadd.f32 %v423_v60, %v259_v57  ;;  %v424_v4 = vmul.f32 %v2327_v53, %v297_v54  ;;  %1796 = vmatprep.subr.mxu1 %v1004_v49  ;;  %v1003_v55 = vld [vmem:[%s3070_s4 + $0x58] sm:$0xff]  ;;  %v1002_v60 = vld [vmem:[%s3070_s4 + $0x50] sm:$0xff] }
  0x83   :  { %1797 = vmatpush3.msra.mxu1 %v1004_v49 }
  0x84   :  { %412 = vperm.xlu0 %1921, %v2332_v56   ;;  %v260_v63 = vadd.f32 %v2323_v52, %v224_v58  ;;  %1798 = vmatprep.subr.mxu1 %v1003_v55 }
  0x85   :  { %1898 = vset.pattern.permute.xlu1 %v2076_v1  ;;  %v2341_v61 = vpop.permute.xlu0 %71  ;;  %1799 = vmatpush3.msra.mxu1 %v1003_v55 }
  0x86   :  { %352 = vperm.xlu1 %1898, %v39_v45   ;;  %v489_v62 = vpop.permute.xlu1 %488  ;;  %v456_v9 = vadd.f32 %v424_v4, %v260_v63  ;;  %v225_v57 = vmul.f32 %v2316_v46, %v2341_v61  ;;  %1800 = vmatprep.subr.mxu1 %v1002_v60  ;;  %v1001_v61 = vld [vmem:[%s3070_s4 + $0x48] sm:$0xff] }
  0x87   :  { %v619_v0 = vmul.f32 %v2336_v59, %v489_v62  ;;  %1801 = vmatpush3.msra.mxu1 %v1002_v60 }
  0x88   :  { %1925 = vset.pattern.permute.xlu0 %v2078_v7  ;;  %1802 = vmatprep.subr.mxu1 %v1001_v61  ;;  %v261_v4 = vadd.f32 %v2323_v52, %v225_v57 }
  0x89   :  { %v2347_v5 = vpop.permute.xlu0 %76  ;;  %v651_v6 = vadd.f32 %v619_v0, %v455_v3  ;;  %612 = vperm.xlu0 %1925, %v2364_v18   ;;  %v2462_v3 = vld [vmem:[%s3066_s0 + $0xb8] sm:$0xff]  ;;  %1803 = vmatpush3.msra.mxu1 %v1001_v61  ;;  %v996_v61 = vld [vmem:[%s3070_s4 + $0x20] sm:$0xff] }
  0x8a   :  { %1899 = vset.pattern.permute.xlu1 %v2077_v2  ;;  %v493_v8 = vpop.permute.xlu1 %492  ;;  %v226_v54 = vmul.f32 %v2316_v46, %v2347_v5 }
  0x8b   :  { %v620_v10 = vmul.f32 %v2336_v59, %v493_v8  ;;  %141 = vperm.xlu1 %1899, %v2231_v30   ;;  %v683_v11 = vmax.f32 %v651_v6, 0.0 }
  0x8c   :  { %v262_v63 = vadd.f32 %v2323_v52, %v226_v54 }
  0x8d   :  { %v652_v13 = vadd.f32 %v620_v10, %v456_v9  ;;  %1742 = vmatprep.mubr.f32.mxu0 %v683_v11 }
  0x8e   :  { %v2355_v14 = vpop.permute.xlu0 %496 }
  0x8f   :  { %146 = vperm.xlu1 %1899, %v41_v12   ;;  %v2357_v15 = vpop.permute.xlu1 %304  ;;  %v684_v16 = vmax.f32 %v652_v13, 0.0  ;;  %v621_v11 = vmul.f32 %v2336_v59, %v2355_v14  ;;  %v998_v14 = vld [vmem:[%s3070_s4 + $0x30] sm:$0xff] }
  0x90   :  { %v426_v0 = vmul.f32 %v2327_v53, %v2357_v15  ;;  %v999_v15 = vld [vmem:[%s3070_s4 + $0x38] sm:$0xff] }
  0x91   :  { %1743 = vmatmul.mubr.f32.vlgmr.msra.gmra.mxu0 %v684_v16 }
  0x92   :  { %v2359_v17 = vpop.permute.xlu0 %504  ;;  %v458_v10 = vadd.f32 %v426_v0, %v262_v63 }
  0x93   :  { %1900 = vset.pattern.permute.xlu1 %v2078_v7 }
  0x94   :  { %548 = vperm.xlu1 %1900, %v39_v45   ;;  %v2368_v19 = vpop.permute.xlu1 %81 }
  0x95   :  { %v227_v6 = vmul.f32 %v2316_v46, %v2368_v19  ;;  %v623_v19 = vmul.f32 %v2336_v59, %v2359_v17  ;;  %v997_v17 = vld [vmem:[%s3070_s4 + $0x28] sm:$0xff] }
  0x96   :  { %v2370_v20 = vpop.permute.xlu0 %512 }
  0x97   :  { %v625_v60 = vmul.f32 %v2336_v59, %v2370_v20 }
  0x98   :  { %1901 = vset.pattern.permute.xlu1 %v2076_v1  ;;  %v2373_v21 = vpop.permute.xlu1 %86 }
  0x99   :  { %360 = vperm.xlu1 %1901, %v41_v12   ;;  %v228_v8 = vmul.f32 %v2316_v46, %v2373_v21 }
  0x9a   :  { %v2375_v22 = vpop.permute.xlu0 %520 }
  0x9b   :  { %v264_v44 = vadd.f32 %v2323_v52, %v228_v8 }
  0x9d   :  { %1902 = vset.pattern.permute.xlu1 %v2077_v2  ;;  %v501_v23 = vpop.permute.xlu1 %500 }
  0x9e   :  { %151 = vperm.xlu1 %1902, %v2240_v32   ;;  %v2379_v24 = vpop.permute.xlu0 %528  ;;  %v622_v5 = vmul.f32 %v2336_v59, %v501_v23 }
  0xa0   :  { %v654_v21 = vadd.f32 %v622_v5, %v458_v10 }
  0xa2   :  { %156 = vperm.xlu1 %1902, %v43_v25   ;;  %v2384_v26 = vpop.permute.xlu1 %312  ;;  %v2386_v27 = vpop.permute.xlu0 %536 }
  0xa3   :  { %v428_v16 = vmul.f32 %v2327_v53, %v2384_v26 }
  0xa5   :  { %v460_v57 = vadd.f32 %v428_v16, %v264_v44  ;;  %v994_v16 = vld [vmem:[%s3070_s4 + $0x10] sm:$0xff] }
  0xa6   :  { %1903 = vset.pattern.permute.xlu1 %v2078_v7  ;;  %v2389_v28 = vpop.permute.xlu0 %544 }
  0xa7   :  { %556 = vperm.xlu1 %1903, %v41_v12   ;;  %v2391_v29 = vpop.permute.xlu1 %91 }
  0xa8   :  { %v229_v49 = vmul.f32 %v2316_v46, %v2391_v29  ;;  %v686_v29 = vmax.f32 %v654_v21, 0.0 }
  0xaa   :  { %v2393_v30 = vpop.permute.xlu0 %552  ;;  %v265_v20 = vadd.f32 %v2323_v52, %v229_v49  ;;  %v992_v49 = vld [vmem:[%s3070_s4] sm:$0xff] }
  0xab   :  { %1904 = vset.pattern.permute.xlu1 %v2076_v1  ;;  %v2396_v31 = vpop.permute.xlu1 %96 }
  0xac   :  { %368 = vperm.xlu1 %1904, %v43_v25   ;;  %v230_v47 = vmul.f32 %v2316_v46, %v2396_v31 }
  0xae   :  { %v2398_v32 = vpop.permute.xlu0 %560 }
  0xb0   :  { %1905 = vset.pattern.permute.xlu1 %v2077_v2  ;;  %v2401_v36 = vpop.permute.xlu1 %508 }
  0xb1   :  { %161 = vperm.xlu1 %1905, %v2247_v33   ;;  %v624_v26 = vmul.f32 %v2336_v59, %v2401_v36 }
  0xb2   :  { %v2404_v39 = vpop.permute.xlu0 %568 }
  0xb3   :  { %v656_v5 = vadd.f32 %v624_v26, %v460_v57 }
  0xb5   :  { %166 = vperm.xlu1 %1905, %v2409_v40   ;;  %v2412_v42 = vpop.permute.xlu1 %320 }
  0xb6   :  { %v2414_v43 = vpop.permute.xlu0 %576  ;;  %v430_v31 = vmul.f32 %v2327_v53, %v2412_v42 }
  0xb9   :  { %1906 = vset.pattern.permute.xlu1 %v2078_v7 }
  0xba   :  { %564 = vperm.xlu1 %1906, %v43_v25   ;;  %v2420_v33 = vpop.permute.xlu1 %101  ;;  %v2422_v45 = vpop.permute.xlu0 %584  ;;  %v263_v25 = vadd.f32 %v2323_v52, %v227_v6 }
  0xbb   :  { %v231_v42 = vmul.f32 %v2316_v46, %v2420_v33 }
  0xbe   :  { %1907 = vset.pattern.permute.xlu1 %v2076_v1  ;;  %v2434_v50 = vpop.permute.xlu1 %106  ;;  %v2436_v51 = vpop.permute.xlu0 %592 }
  0xbf   :  { %376 = vperm.xlu1 %1907, %v2409_v40  }
  0xc2   :  { %v2446_v58 = vpop.permute.xlu0 %600 }
  0xc3   :  { %1908 = vset.pattern.permute.xlu1 %v2077_v2  ;;  %v517_v62 = vpop.permute.xlu1 %516 }
  0xc4   :  { %171 = vperm.xlu1 %1908, %v2253_v34   ;;  %v1000_v34 = vld [vmem:[%s3070_s4 + $0x40] sm:$0xff] }
  0xc5   :  { %1804 = vmatprep.subr.mxu1 %v1000_v34 }
  0xc6   :  { %1805 = vmatpush3.msra.mxu1 %v1000_v34 }
  0xc7   :  { %v301_v9 = vpop.permute.xlu0 %300  ;;  %1806 = vmatprep.subr.mxu1 %v999_v15 }
  0xc8   :  { %v425_v12 = vmul.f32 %v2327_v53, %v301_v9  ;;  %176 = vperm.xlu1 %1908, %v2462_v3   ;;  %v329_v13 = vpop.permute.xlu1 %328  ;;  %1807 = vmatpush3.msra.mxu1 %v999_v15  ;;  %v995_v9 = vld [vmem:[%s3070_s4 + $0x18] sm:$0xff] }
  0xc9   :  { %1808 = vmatprep.subr.mxu1 %v998_v14 }
  0xca   :  { %v457_v23 = vadd.f32 %v425_v12, %v261_v4  ;;  %1809 = vmatpush3.msra.mxu1 %v998_v14  ;;  %v266_v4 = vadd.f32 %v2323_v52, %v230_v47  ;;  %v688_v14 = vmax.f32 %v656_v5, 0.0  ;;  %v993_v47 = vld [vmem:[%s3070_s4 + $0x8] sm:$0xff] }
  0xcb   :  { %v309_v48 = vpop.permute.xlu0 %308  ;;  %1810 = vmatprep.subr.mxu1 %v997_v17 }
  0xcc   :  { %v427_v54 = vmul.f32 %v2327_v53, %v309_v48  ;;  %1909 = vset.pattern.permute.xlu1 %v2078_v7  ;;  %v653_v55 = vadd.f32 %v621_v11, %v457_v23  ;;  %1811 = vmatpush3.msra.mxu1 %v997_v17  ;;  %v462_v10 = vadd.f32 %v430_v31, %v266_v4 }
  0xcd   :  { %572 = vperm.xlu1 %1909, %v2409_v40   ;;  %v112_v36 = vpop.permute.xlu1 %111  ;;  %v626_v40 = vmul.f32 %v2336_v59, %v517_v62  ;;  %1812 = vmatprep.subr.mxu1 %v996_v61  ;;  %v232_v11 = vmul.f32 %v2316_v46, %v2434_v50  ;;  %v627_v62 = vmul.f32 %v2336_v59, %v2375_v22 }
  0xce   :  { %v459_v63 = vadd.f32 %v427_v54, %v263_v25  ;;  %v685_v0 = vmax.f32 %v653_v55, 0.0  ;;  %1813 = vmatpush3.msra.mxu1 %v996_v61  ;;  %v432_v50 = vmul.f32 %v2327_v53, %v329_v13  ;;  %v233_v25 = vmul.f32 %v2316_v46, %v112_v36 }
  0xcf   :  { %v317_v34 = vpop.permute.xlu0 %316  ;;  %1814 = vmatprep.subr.mxu1 %v995_v9  ;;  %v658_v21 = vadd.f32 %v626_v40, %v462_v10  ;;  %v268_v26 = vadd.f32 %v2323_v52, %v232_v11  ;;  %v629_v54 = vmul.f32 %v2336_v59, %v2379_v24 }
  0xd0   :  { %v429_v6 = vmul.f32 %v2327_v53, %v317_v34  ;;  %1745 = vmatprep.mubr.f32.mxu0 %v685_v0  ;;  %v655_v8 = vadd.f32 %v623_v19, %v459_v63  ;;  %v267_v19 = vadd.f32 %v2323_v52, %v231_v42  ;;  %1815 = vmatpush3.msra.mxu1 %v995_v9  ;;  %v49_v0 = vld [vmem:[%s3066_s0 + $0xc8] sm:$0xff] }
  0xd1   :  { %1910 = vset.pattern.permute.xlu1 %v2076_v1  ;;  %v117_v33 = vpop.permute.xlu1 %116  ;;  %1746 = vmatmul.mubr.f32.gmra.mxu0 %v686_v29  ;;  %v464_v55 = vadd.f32 %v432_v50, %v268_v26  ;;  %v690_v36 = vmax.f32 %v658_v21, 0.0 }
  0xd2   :  { %v461_v12 = vadd.f32 %v429_v6, %v265_v20  ;;  %384 = vperm.xlu1 %1910, %v2462_v3   ;;  %v687_v15 = vmax.f32 %v655_v8, 0.0  ;;  %1816 = vmatprep.subr.mxu1 %v994_v16  ;;  %v234_v10 = vmul.f32 %v2316_v46, %v117_v33  ;;  %v51_v33 = vld [vmem:[%s3066_s0 + $0xd8] sm:$0xff] }
  0xd3   :  { %v325_v23 = vpop.permute.xlu0 %324  ;;  %1817 = vmatpush3.msra.mxu1 %v994_v16 }
  0xd4   :  { %v431_v22 = vmul.f32 %v2327_v53, %v325_v23  ;;  %1748 = vmatprep.mubr.f32.mxu0 %v687_v15  ;;  %v657_v44 = vadd.f32 %v625_v60, %v461_v12  ;;  %1818 = vmatprep.subr.mxu1 %v993_v47  ;;  %v269_v60 = vadd.f32 %v2323_v52, %v233_v25 }
  0xd5   :  { %1749 = vmatmul.mubr.f32.gmra.mxu0 %v688_v14  ;;  %1819 = vmatpush3.msra.mxu1 %v993_v47  ;;  %v270_v15 = vadd.f32 %v2323_v52, %v234_v10 }
  0xd6   :  { %v463_v48 = vadd.f32 %v431_v22, %v267_v19  ;;  %1911 = vset.pattern.permute.xlu1 %v2077_v2  ;;  %v525_v13 = vpop.permute.xlu1 %524  ;;  %v689_v17 = vmax.f32 %v657_v44, 0.0  ;;  %1820 = vmatprep.subr.mxu1 %v992_v49 }
  0xd7   :  { %v628_v57 = vmul.f32 %v2336_v59, %v525_v13  ;;  %181 = vperm.xlu1 %1911, %v2260_v35   ;;  %v333_v31 = vpop.permute.xlu0 %332  ;;  %1821 = vmatpush3.msra.mxu1 %v992_v49  ;;  %v633_v49 = vmul.f32 %v2336_v59, %v2389_v28 }
  0xd8   :  { %v433_v63 = vmul.f32 %v2327_v53, %v333_v31  ;;  %1751 = vmatprep.mubr.f32.mxu0 %v689_v17  ;;  %v659_v29 = vadd.f32 %v627_v62, %v463_v48 }
  0xd9   :  { %v660_v24 = vadd.f32 %v628_v57, %v464_v55  ;;  %1752 = vmatmul.mubr.f32.gmra.mxu0 %v690_v36 }
  0xda   :  { %v465_v61 = vadd.f32 %v433_v63, %v269_v60  ;;  %v691_v4 = vmax.f32 %v659_v29, 0.0  ;;  %v53_v60 = vld [vmem:[%s3066_s0 + $0xe8] sm:$0xff] }
  0xdb   :  { %186 = vperm.xlu1 %1911, %v49_v0   ;;  %v337_v35 = vpop.permute.xlu1 %336  ;;  %v692_v5 = vmax.f32 %v660_v24, 0.0  ;;  %v341_v20 = vpop.permute.xlu0 %340 }
  0xdc   :  { %1754 = vmatprep.mubr.f32.mxu0 %v691_v4  ;;  %v661_v42 = vadd.f32 %v629_v54, %v465_v61  ;;  %v435_v9 = vmul.f32 %v2327_v53, %v341_v20  ;;  %v434_v62 = vmul.f32 %v2327_v53, %v337_v35  ;;  %v635_v20 = vmul.f32 %v2336_v59, %v2393_v30 }
  0xdd   :  { %1755 = vmatmul.mubr.f32.gmra.mxu0 %v692_v5 }
  0xde   :  { %v693_v40 = vmax.f32 %v661_v42, 0.0  ;;  %v466_v19 = vadd.f32 %v434_v62, %v270_v15 }
  0xdf   :  { %1912 = vset.pattern.permute.xlu1 %v2078_v7  ;;  %v349_v44 = vpop.permute.xlu0 %348 }
  0xe0   :  { %580 = vperm.xlu1 %1912, %v2462_v3   ;;  %v122_v34 = vpop.permute.xlu1 %121  ;;  %1757 = vmatprep.mubr.f32.mxu0 %v693_v40  ;;  %v631_v3 = vmul.f32 %v2336_v59, %v2386_v27  ;;  %v437_v26 = vmul.f32 %v2327_v53, %v349_v44 }
  0xe1   :  { %v235_v6 = vmul.f32 %v2316_v46, %v122_v34 }
  0xe3   :  { %v271_v8 = vadd.f32 %v2323_v52, %v235_v6  ;;  %v357_v4 = vpop.permute.xlu0 %356 }
  0xe4   :  { %1913 = vset.pattern.permute.xlu1 %v2076_v1  ;;  %v127_v11 = vpop.permute.xlu1 %126  ;;  %v439_v5 = vmul.f32 %v2327_v53, %v357_v4 }
  0xe5   :  { %392 = vperm.xlu1 %1913, %v49_v0   ;;  %v467_v12 = vadd.f32 %v435_v9, %v271_v8  ;;  %v236_v48 = vmul.f32 %v2316_v46, %v127_v11 }
  0xe7   :  { %v663_v50 = vadd.f32 %v631_v3, %v467_v12  ;;  %v272_v55 = vadd.f32 %v2323_v52, %v236_v48 }
  0xe9   :  { %1914 = vset.pattern.permute.xlu1 %v2077_v2  ;;  %v533_v16 = vpop.permute.xlu1 %532  ;;  %v695_v25 = vmax.f32 %v663_v50, 0.0 }
  0xea   :  { %v630_v21 = vmul.f32 %v2336_v59, %v533_v16  ;;  %191 = vperm.xlu1 %1914, %v2271_v37  }
  0xec   :  { %v662_v23 = vadd.f32 %v630_v21, %v466_v19 }
  0xee   :  { %196 = vperm.xlu1 %1914, %v51_v33   ;;  %v345_v14 = vpop.permute.xlu1 %344  ;;  %v694_v27 = vmax.f32 %v662_v23, 0.0 }
  0xef   :  { %v436_v17 = vmul.f32 %v2327_v53, %v345_v14 }
  0xf0   :  { %1758 = vmatmul.mubr.f32.gmra.mxu0 %v694_v27  ;;  %v637_v27 = vmul.f32 %v2336_v59, %v2398_v32 }
  0xf1   :  { %1760 = vmatprep.mubr.f32.mxu0 %v695_v25  ;;  %v468_v31 = vadd.f32 %v436_v17, %v272_v55 }
  0xf2   :  { %1915 = vset.pattern.permute.xlu1 %v2078_v7 }
  0xf3   :  { %588 = vperm.xlu1 %1915, %v49_v0   ;;  %v132_v22 = vpop.permute.xlu1 %131 }
  0xf4   :  { %v237_v47 = vmul.f32 %v2316_v46, %v132_v22 }
  0xf6   :  { %v273_v37 = vadd.f32 %v2323_v52, %v237_v47 }
  0xf7   :  { %1916 = vset.pattern.permute.xlu1 %v2076_v1  ;;  %v137_v13 = vpop.permute.xlu1 %136 }
  0xf8   :  { %400 = vperm.xlu1 %1916, %v51_v33   ;;  %v469_v54 = vadd.f32 %v437_v26, %v273_v37  ;;  %v238_v42 = vmul.f32 %v2316_v46, %v137_v13 }
  0xfa   :  { %v665_v63 = vadd.f32 %v633_v49, %v469_v54  ;;  %v274_v8 = vadd.f32 %v2323_v52, %v238_v42 }
  0xfc   :  { %1917 = vset.pattern.permute.xlu1 %v2077_v2  ;;  %v541_v57 = vpop.permute.xlu1 %540  ;;  %v697_v24 = vmax.f32 %v665_v63, 0.0 }
  0xfd   :  { %v632_v36 = vmul.f32 %v2336_v59, %v541_v57  ;;  %201 = vperm.xlu1 %1917, %v2277_v38  }
  0xff   :  { %v664_v0 = vadd.f32 %v632_v36, %v468_v31 }
 0x101   :  { %206 = vperm.xlu1 %1917, %v53_v60   ;;  %v353_v29 = vpop.permute.xlu1 %352  ;;  %v696_v28 = vmax.f32 %v664_v0, 0.0 }
 0x102   :  { %v438_v34 = vmul.f32 %v2327_v53, %v353_v29 }
 0x103   :  { %1761 = vmatmul.mubr.f32.gmra.mxu0 %v696_v28 }
 0x104   :  { %1763 = vmatprep.mubr.f32.mxu0 %v697_v24  ;;  %v470_v10 = vadd.f32 %v438_v34, %v274_v8 }
 0x105   :  { %1918 = vset.pattern.permute.xlu1 %v2078_v7 }
 0x106   :  { %596 = vperm.xlu1 %1918, %v51_v33   ;;  %v142_v61 = vpop.permute.xlu1 %141 }
 0x107   :  { %v239_v35 = vmul.f32 %v2316_v46, %v142_v61 }
 0x109   :  { %v275_v38 = vadd.f32 %v2323_v52, %v239_v35 }
 0x10a   :  { %1919 = vset.pattern.permute.xlu1 %v2076_v1  ;;  %v147_v40 = vpop.permute.xlu1 %146 }
 0x10b   :  { %408 = vperm.xlu1 %1919, %v53_v60   ;;  %v471_v6 = vadd.f32 %v439_v5, %v275_v38  ;;  %v240_v50 = vmul.f32 %v2316_v46, %v147_v40 }
 0x10d   :  { %v667_v62 = vadd.f32 %v635_v20, %v471_v6  ;;  %v276_v22 = vadd.f32 %v2323_v52, %v240_v50 }
 0x10f   :  { %1920 = vset.pattern.permute.xlu1 %v2077_v2  ;;  %v549_v9 = vpop.permute.xlu1 %548  ;;  %v699_v16 = vmax.f32 %v667_v62, 0.0  ;;  %v365_v2 = vpop.permute.xlu0 %364 }
 0x110   :  { %v634_v11 = vmul.f32 %v2336_v59, %v549_v9  ;;  %211 = vperm.xlu1 %1920, %v2332_v56   ;;  %v441_v33 = vmul.f32 %v2327_v53, %v365_v2 }
 0x112   :  { %v666_v3 = vadd.f32 %v634_v11, %v470_v10  ;;  %v641_v10 = vmul.f32 %v2336_v59, %v2414_v43 }
 0x113   :  { %v373_v32 = vpop.permute.xlu0 %372 }
 0x114   :  { %216 = vperm.xlu1 %1920, %v2364_v18   ;;  %v361_v12 = vpop.permute.xlu1 %360  ;;  %v698_v15 = vmax.f32 %v666_v3, 0.0 }
 0x115   :  { %v440_v14 = vmul.f32 %v2327_v53, %v361_v12 }
 0x116   :  { %1764 = vmatmul.mubr.f32.gmra.mxu0 %v698_v15 }
 0x117   :  { %1766 = vmatprep.mubr.f32.mxu0 %v699_v16  ;;  %v472_v47 = vadd.f32 %v440_v14, %v276_v22  ;;  %v381_v5 = vpop.permute.xlu0 %380 }
 0x118   :  { %1922 = vset.pattern.permute.xlu1 %v2078_v7  ;;  %v445_v34 = vmul.f32 %v2327_v53, %v381_v5 }
 0x119   :  { %604 = vperm.xlu1 %1922, %v53_v60   ;;  %v152_v30 = vpop.permute.xlu1 %151  ;;  %v639_v60 = vmul.f32 %v2336_v59, %v2404_v39 }
 0x11a   :  { %v241_v19 = vmul.f32 %v2316_v46, %v152_v30 }
 0x11b   :  { %v389_v50 = vpop.permute.xlu0 %388 }
 0x11c   :  { %v277_v21 = vadd.f32 %v2323_v52, %v241_v19  ;;  %v2629_v19 = vld [vmem:[%s3068_s2 + $0x1] ss:$0 sm:$0xff]  ;;  %v447_v22 = vmul.f32 %v2327_v53, %v389_v50 }
 0x11d   :  { %1923 = vset.pattern.permute.xlu1 %v2076_v1  ;;  %v157_v23 = vpop.permute.xlu1 %156 }
 0x11e   :  { %416 = vperm.xlu1 %1923, %v2364_v18   ;;  %v473_v25 = vadd.f32 %v441_v33, %v277_v21  ;;  %v242_v55 = vmul.f32 %v2316_v46, %v157_v23 }
 0x120   :  { %v669_v1 = vadd.f32 %v637_v27, %v473_v25  ;;  %v278_v36 = vadd.f32 %v2323_v52, %v242_v55 }
 0x122   :  { %1924 = vset.pattern.permute.xlu1 %v2078_v7  ;;  %v557_v44 = vpop.permute.xlu1 %556  ;;  %v701_v13 = vmax.f32 %v669_v1, 0.0  ;;  %v443_v7 = vmul.f32 %v2327_v53, %v373_v32 }
 0x123   :  { %v636_v37 = vmul.f32 %v2336_v59, %v557_v44  ;;  %608 = vperm.xlu1 %1924, %v2332_v56  }
 0x125   :  { %v668_v26 = vadd.f32 %v636_v37, %v472_v47 }
 0x127   :  { %v369_v48 = vpop.permute.xlu1 %368  ;;  %v700_v18 = vmax.f32 %v668_v26, 0.0 }
 0x128   :  { %v442_v56 = vmul.f32 %v2327_v53, %v369_v48 }
 0x129   :  { %1767 = vmatmul.mubr.f32.gmra.mxu0 %v700_v18 }
 0x12a   :  { %1769 = vmatprep.mubr.f32.mxu0 %v701_v13  ;;  %v474_v0 = vadd.f32 %v442_v56, %v278_v36  ;;  %v643_v13 = vmul.f32 %v2336_v59, %v2422_v45 }
 0x12c   :  { %v162_v17 = vpop.permute.xlu1 %161 }
 0x12d   :  { %v243_v49 = vmul.f32 %v2316_v46, %v162_v17 }
 0x12f   :  { %v279_v54 = vadd.f32 %v2323_v52, %v243_v49 }
 0x130   :  { %v167_v57 = vpop.permute.xlu1 %166 }
 0x131   :  { %v475_v31 = vadd.f32 %v443_v7, %v279_v54  ;;  %v244_v39 = vmul.f32 %v2316_v46, %v167_v57 }
 0x133   :  { %v671_v28 = vadd.f32 %v639_v60, %v475_v31  ;;  %v280_v9 = vadd.f32 %v2323_v52, %v244_v39 }
 0x135   :  { %v565_v63 = vpop.permute.xlu1 %564  ;;  %v703_v35 = vmax.f32 %v671_v28, 0.0 }
 0x136   :  { %v638_v29 = vmul.f32 %v2336_v59, %v565_v63 }
 0x138   :  { %v670_v24 = vadd.f32 %v638_v29, %v474_v0  ;;  %v397_v0 = vpop.permute.xlu0 %396 }
 0x139   :  { %v449_v29 = vmul.f32 %v2327_v53, %v397_v0 }
 0x13a   :  { %v377_v61 = vpop.permute.xlu1 %376  ;;  %v702_v4 = vmax.f32 %v670_v24, 0.0 }
 0x13b   :  { %v444_v6 = vmul.f32 %v2327_v53, %v377_v61 }
 0x13c   :  { %1770 = vmatmul.mubr.f32.gmra.mxu0 %v702_v4  ;;  %v645_v4 = vmul.f32 %v2336_v59, %v2436_v51 }
 0x13d   :  { %1772 = vmatprep.mubr.f32.mxu0 %v703_v35  ;;  %v476_v62 = vadd.f32 %v444_v6, %v280_v9 }
 0x13f   :  { %v172_v38 = vpop.permute.xlu1 %171 }
 0x140   :  { %v245_v42 = vmul.f32 %v2316_v46, %v172_v38 }
 0x142   :  { %v281_v40 = vadd.f32 %v2323_v52, %v245_v42 }
 0x143   :  { %v177_v20 = vpop.permute.xlu1 %176 }
 0x144   :  { %v477_v8 = vadd.f32 %v445_v34, %v281_v40  ;;  %v246_v44 = vmul.f32 %v2316_v46, %v177_v20 }
 0x146   :  { %v673_v12 = vadd.f32 %v641_v10, %v477_v8  ;;  %v282_v18 = vadd.f32 %v2323_v52, %v246_v44  ;;  %v405_v10 = vpop.permute.xlu0 %404 }
 0x148   :  { %v573_v11 = vpop.permute.xlu1 %572  ;;  %v705_v2 = vmax.f32 %v673_v12, 0.0 }
 0x149   :  { %v640_v3 = vmul.f32 %v2336_v59, %v573_v11 }
 0x14b   :  { %v672_v15 = vadd.f32 %v640_v3, %v476_v62  ;;  %v451_v62 = vmul.f32 %v2327_v53, %v405_v10 }
 0x14d   :  { %v385_v16 = vpop.permute.xlu1 %384  ;;  %v704_v30 = vmax.f32 %v672_v15, 0.0 }
 0x14e   :  { %v446_v26 = vmul.f32 %v2327_v53, %v385_v16  ;;  %v647_v16 = vmul.f32 %v2336_v59, %v2446_v58 }
 0x14f   :  { %1773 = vmatmul.mubr.f32.gmra.mxu0 %v704_v30 }
 0x150   :  { %1775 = vmatprep.mubr.f32.mxu0 %v705_v2  ;;  %v478_v32 = vadd.f32 %v446_v26, %v282_v18  ;;  %v413_v26 = vpop.permute.xlu0 %412 }
 0x151   :  { %v1744_v21 = vpop.f32.mrf.mxu0 }
 0x152   :  { %v182_v33 = vpop.permute.xlu1 %181  ;;  %v807_v43 = vadd.f32 %v1744_v21, %v2629_v19 }
 0x153   :  { %v247_v23 = vmul.f32 %v2316_v46, %v182_v33  ;;  %v801_v14 = vpop.f32.mrf.mxu0 }
 0x154   :  { %v802_v27 = vadd.f32 %v2629_v19, %v801_v14  ;;  %v961_v1 = vmax.f32 %v807_v43, 0.0 }
 0x155   :  { %v283_v25 = vadd.f32 %v2323_v52, %v247_v23 }
 0x156   :  { %v187_v47 = vpop.permute.xlu1 %186  ;;  %v960_v37 = vmax.f32 %v802_v27, 0.0 }
 0x157   :  { %v479_v48 = vadd.f32 %v447_v22, %v283_v25  ;;  %v248_v63 = vmul.f32 %v2316_v46, %v187_v47 }
 0x158   :  { %1822 = vmatprep.mubr.f32.mxu1 %v960_v37 }
 0x159   :  { %1823 = vmatmul.mubr.f32.vlgmr.msra.gmra.mxu1 %v961_v1  ;;  %v675_v54 = vadd.f32 %v643_v13, %v479_v48  ;;  %v284_v61 = vadd.f32 %v2323_v52, %v248_v63 }
 0x15b   :  { %v581_v17 = vpop.permute.xlu1 %580  ;;  %v707_v56 = vmax.f32 %v675_v54, 0.0 }
 0x15c   :  { %v642_v49 = vmul.f32 %v2336_v59, %v581_v17 }
 0x15e   :  { %v674_v7 = vadd.f32 %v642_v49, %v478_v32 }
 0x160   :  { %v706_v55 = vmax.f32 %v674_v7, 0.0  ;;  %v393_v57 = vpop.permute.xlu1 %392 }
 0x161   :  { %v448_v28 = vmul.f32 %v2327_v53, %v393_v57 }
 0x162   :  { %1776 = vmatmul.mubr.f32.gmra.mxu0 %v706_v55 }
 0x163   :  { %1778 = vmatprep.mubr.f32.mxu0 %v707_v56  ;;  %v480_v38 = vadd.f32 %v448_v28, %v284_v61 }
 0x165   :  { %v192_v31 = vpop.permute.xlu1 %191 }
 0x166   :  { %v249_v36 = vmul.f32 %v2316_v46, %v192_v31 }
 0x168   :  { %v285_v60 = vadd.f32 %v2323_v52, %v249_v36 }
 0x169   :  { %v197_v45 = vpop.permute.xlu1 %196 }
 0x16a   :  { %v481_v24 = vadd.f32 %v449_v29, %v285_v60  ;;  %v250_v11 = vmul.f32 %v2316_v46, %v197_v45  ;;  %v613_v60 = vpop.permute.xlu0 %612 }
 0x16c   :  { %v677_v42 = vadd.f32 %v645_v4, %v481_v24  ;;  %v286_v15 = vadd.f32 %v2323_v52, %v250_v11 }
 0x16e   :  { %v589_v35 = vpop.permute.xlu1 %588  ;;  %v709_v20 = vmax.f32 %v677_v42, 0.0  ;;  %v650_v42 = vmul.f32 %v2336_v59, %v613_v60 }
 0x16f   :  { %v644_v5 = vmul.f32 %v2336_v59, %v589_v35 }
 0x171   :  { %v676_v40 = vadd.f32 %v644_v5, %v480_v38 }
 0x173   :  { %v708_v34 = vmax.f32 %v676_v40, 0.0  ;;  %v401_v39 = vpop.permute.xlu1 %400  ;;  %v453_v40 = vmul.f32 %v2327_v53, %v413_v26 }
 0x174   :  { %v450_v3 = vmul.f32 %v2327_v53, %v401_v39 }
 0x175   :  { %1779 = vmatmul.mubr.f32.gmra.mxu0 %v708_v34 }
 0x176   :  { %1781 = vmatprep.mubr.f32.mxu0 %v709_v20  ;;  %v482_v2 = vadd.f32 %v450_v3, %v286_v15 }
 0x178   :  { %v202_v6 = vpop.permute.xlu1 %201 }
 0x179   :  { %v251_v8 = vmul.f32 %v2316_v46, %v202_v6 }
 0x17b   :  { %v287_v9 = vadd.f32 %v2323_v52, %v251_v8 }
 0x17c   :  { %v207_v51 = vpop.permute.xlu1 %206 }
 0x17d   :  { %v483_v12 = vadd.f32 %v451_v62, %v287_v9  ;;  %v252_v25 = vmul.f32 %v2316_v46, %v207_v51 }
 0x17f   :  { %v679_v33 = vadd.f32 %v647_v16, %v483_v12  ;;  %v288_v58 = vadd.f32 %v2323_v52, %v252_v25 }
 0x181   :  { %v597_v30 = vpop.permute.xlu1 %596  ;;  %v711_v14 = vmax.f32 %v679_v33, 0.0 }
 0x182   :  { %v646_v21 = vmul.f32 %v2336_v59, %v597_v30 }
 0x184   :  { %v678_v50 = vadd.f32 %v646_v21, %v482_v2 }
 0x186   :  { %v710_v43 = vmax.f32 %v678_v50, 0.0  ;;  %v409_v23 = vpop.permute.xlu1 %408 }
 0x187   :  { %v452_v44 = vmul.f32 %v2327_v53, %v409_v23 }
 0x188   :  { %1782 = vmatmul.mubr.f32.gmra.mxu0 %v710_v43 }
 0x189   :  { %1784 = vmatprep.mubr.f32.mxu0 %v711_v14  ;;  %v484_v13 = vadd.f32 %v452_v44, %v288_v58 }
 0x18b   :  { %v212_v27 = vpop.permute.xlu1 %211 }
 0x18c   :  { %v253_v7 = vmul.f32 %v2316_v46, %v212_v27 }
 0x18f   :  { %v217_v22 = vpop.permute.xlu1 %216 }
 0x190   :  { %v254_v49 = vmul.f32 %v2316_v46, %v217_v22  ;;  %v289_v46 = vadd.f32 %v2323_v52, %v253_v7 }
 0x191   :  { %v1747_v47 = vpop.f32.mrf.mxu0 }
 0x192   :  { %v817_v37 = vadd.f32 %v1747_v47, %v2629_v19  ;;  %v290_v29 = vadd.f32 %v2323_v52, %v254_v49  ;;  %v485_v8 = vadd.f32 %v453_v40, %v289_v46 }
 0x193   :  { %v811_v1 = vpop.f32.mrf.mxu0 }
 0x194   :  { %v812_v48 = vadd.f32 %v2629_v19, %v811_v1  ;;  %v605_v18 = vpop.permute.xlu1 %604  ;;  %v963_v55 = vmax.f32 %v817_v37, 0.0 }
 0x195   :  { %v648_v17 = vmul.f32 %v2336_v59, %v605_v18  ;;  %v1750_v32 = vpop.f32.mrf.mxu0 }
 0x196   :  { %v962_v54 = vmax.f32 %v812_v48, 0.0  ;;  %v827_v56 = vadd.f32 %v1750_v32, %v2629_v19 }
 0x197   :  { %v680_v57 = vadd.f32 %v648_v17, %v484_v13  ;;  %v821_v31 = vpop.f32.mrf.mxu0 }
 0x198   :  { %v822_v36 = vadd.f32 %v2629_v19, %v821_v31  ;;  %1825 = vmatprep.mubr.f32.mxu1 %v962_v54  ;;  %v965_v61 = vmax.f32 %v827_v56, 0.0 }
 0x199   :  { %v712_v63 = vmax.f32 %v680_v57, 0.0  ;;  %v417_v0 = vpop.permute.xlu1 %416  ;;  %v1753_v45 = vpop.f32.mrf.mxu0  ;;  %1826 = vmatmul.mubr.f32.gmra.mxu1 %v963_v55 }
 0x19a   :  { %v964_v28 = vmax.f32 %v822_v36, 0.0  ;;  %v454_v24 = vmul.f32 %v2327_v53, %v417_v0  ;;  %v837_v4 = vadd.f32 %v1753_v45, %v2629_v19 }
 0x19b   :  { %v831_v35 = vpop.f32.mrf.mxu0  ;;  %1785 = vmatmul.mubr.f32.gmra.mxu0 %v712_v63 }
 0x19c   :  { %v486_v38 = vadd.f32 %v454_v24, %v290_v29  ;;  %v832_v5 = vadd.f32 %v2629_v19, %v831_v35  ;;  %1828 = vmatprep.mubr.f32.mxu1 %v964_v28  ;;  %v967_v6 = vmax.f32 %v837_v4, 0.0  ;;  %v2693_v29 = vand.u32 127, %v219_v41  ;;  %v2698_v28 = vld [vmem:[%s3071_s5] ss:$0 sm:$0xff]  ;;  %s2079_s5 = smov [#allocation2]  }
 0x19d   :  { %v1756_v34 = vpop.f32.mrf.mxu0  ;;  %1829 = vmatmul.mubr.f32.gmra.mxu1 %v965_v61  ;;  %s1600_s3 = sshll.u32 %s2079_s5, 4  ;;  %s1601_s3 = int_to_ptr.vmem [resolvable:$true] %s1600_s3 }
 0x19e   :  { %v966_v39 = vmax.f32 %v832_v5, 0.0  ;;  %v609_v20 = vpop.permute.xlu1 %608  ;;  %v847_v52 = vadd.f32 %v1756_v34, %v2629_v19  ;;  %v682_v11 = vadd.f32 %v650_v42, %v486_v38  ;;  %vm1242_vm0 = vcmp.lt.s32.totalorder %v2693_v29, 25  ;;  %s2054_s1 = scalar_lea.vmem %s1601_s3, 4096  ;;  %p2059_p1 = scmp.lt.s32.totalorder %s1601_s3, %s1601_s3 }
 0x19f   :  { %v649_v9 = vmul.f32 %v2336_v59, %v609_v20  ;;  %v841_v10 = vpop.f32.mrf.mxu0  ;;  %p2055_p0 = scmp.ne.s32.totalorder %s1601_s3, %s2054_s1  ;;  %p2060_p2 = scmp.lt.s32.totalorder %s2054_s1, %s2054_s1 }
 0x1a0   :  { %v842_v51 = vadd.f32 %v2629_v19, %v841_v10  ;;  %1831 = vmatprep.mubr.f32.mxu1 %v966_v39  ;;  %v969_v12 = vmax.f32 %v847_v52, 0.0  ;;  %v714_v15 = vmax.f32 %v682_v11, 0.0 }
 0x1a1   :  { %v681_v62 = vadd.f32 %v649_v9, %v485_v8  ;;  %1832 = vmatmul.mubr.f32.gmra.mxu1 %v967_v6  ;;  %p2061_p3 = por %p2060_p2, %p2059_p1 }
 0x1a2   :  { %v968_v3 = vmax.f32 %v842_v51, 0.0 }
 0x1a3   :  { %v713_v53 = vmax.f32 %v681_v62, 0.0  ;;  %p2062_p4 = pnand %p2061_p3, %p2055_p0 }
 0x1a4   :  { %1834 = vmatprep.mubr.f32.mxu1 %v968_v3 }
 0x1a5   :  { %1787 = vmatprep.mubr.f32.mxu0 %v713_v53  ;;  %1835 = vmatmul.mubr.f32.gmra.mxu1 %v969_v12 }
 0x1a6   :  { %1788 = vmatmul.mubr.f32.gmra.mxu0 %v714_v15 }
 0x1b0   :  { %v1759_v16 = vpop.f32.mrf.mxu0 }
 0x1b1   :  { %v857_v30 = vadd.f32 %v1759_v16, %v2629_v19 }
 0x1b2   :  { %v851_v2 = vpop.f32.mrf.mxu0 }
 0x1b3   :  { %v852_v59 = vadd.f32 %v2629_v19, %v851_v2  ;;  %v971_v33 = vmax.f32 %v857_v30, 0.0 }
 0x1b5   :  { %v970_v21 = vmax.f32 %v852_v59, 0.0 }
 0x1b7   :  { %1837 = vmatprep.mubr.f32.mxu1 %v970_v21 }
 0x1b8   :  { %1838 = vmatmul.mubr.f32.gmra.mxu1 %v971_v33 }
 0x1c3   :  { %v1762_v50 = vpop.f32.mrf.mxu0 }
 0x1c4   :  { %v867_v43 = vadd.f32 %v1762_v50, %v2629_v19 }
 0x1c5   :  { %v861_v23 = vpop.f32.mrf.mxu0 }
 0x1c6   :  { %v862_v14 = vadd.f32 %v2629_v19, %v861_v23  ;;  %v973_v25 = vmax.f32 %v867_v43, 0.0 }
 0x1c8   :  { %v972_v27 = vmax.f32 %v862_v14, 0.0 }
 0x1ca   :  { %1840 = vmatprep.mubr.f32.mxu1 %v972_v27 }
 0x1cb   :  { %1841 = vmatmul.mubr.f32.gmra.mxu1 %v973_v25 }
 0x1d6   :  { %v1765_v22 = vpop.f32.mrf.mxu0 }
 0x1d7   :  { %v877_v44 = vadd.f32 %v1765_v22, %v2629_v19 }
 0x1d8   :  { %v871_v47 = vpop.f32.mrf.mxu0 }
 0x1d9   :  { %v872_v58 = vadd.f32 %v2629_v19, %v871_v47  ;;  %v975_v1 = vmax.f32 %v877_v44, 0.0 }
 0x1db   :  { %v974_v37 = vmax.f32 %v872_v58, 0.0 }
 0x1dd   :  { %1843 = vmatprep.mubr.f32.mxu1 %v974_v37 }
 0x1de   :  { %1844 = vmatmul.mubr.f32.gmra.mxu1 %v975_v1 }
 0x1e9   :  { %v1768_v26 = vpop.f32.mrf.mxu0 }
 0x1ea   :  { %v887_v48 = vadd.f32 %v1768_v26, %v2629_v19 }
 0x1eb   :  { %v881_v18 = vpop.f32.mrf.mxu0 }
 0x1ec   :  { %v882_v13 = vadd.f32 %v2629_v19, %v881_v18  ;;  %v977_v32 = vmax.f32 %v887_v48, 0.0 }
 0x1ee   :  { %v976_v17 = vmax.f32 %v882_v13, 0.0 }
 0x1f0   :  { %1846 = vmatprep.mubr.f32.mxu1 %v976_v17 }
 0x1f1   :  { %1847 = vmatmul.mubr.f32.gmra.mxu1 %v977_v32 }
 0x1fc   :  { %v1771_v49 = vpop.f32.mrf.mxu0 }
 0x1fd   :  { %v897_v54 = vadd.f32 %v1771_v49, %v2629_v19 }
 0x1fe   :  { %v891_v7 = vpop.f32.mrf.mxu0 }
 0x1ff   :  { %v892_v55 = vadd.f32 %v2629_v19, %v891_v7  ;;  %v979_v56 = vmax.f32 %v897_v54, 0.0 }
 0x201   :  { %v978_v57 = vmax.f32 %v892_v55, 0.0 }
 0x203   :  { %1849 = vmatprep.mubr.f32.mxu1 %v978_v57 }
 0x204   :  { %1850 = vmatmul.mubr.f32.gmra.mxu1 %v979_v56 }
 0x20f   :  { %v1774_v31 = vpop.f32.mrf.mxu0 }
 0x210   :  { %v907_v36 = vadd.f32 %v1774_v31, %v2629_v19 }
 0x211   :  { %v901_v60 = vpop.f32.mrf.mxu0 }
 0x212   :  { %v902_v63 = vadd.f32 %v2629_v19, %v901_v60  ;;  %v981_v45 = vmax.f32 %v907_v36, 0.0 }
 0x214   :  { %v980_v0 = vmax.f32 %v902_v63, 0.0 }
 0x216   :  { %1852 = vmatprep.mubr.f32.mxu1 %v980_v0 }
 0x217   :  { %1853 = vmatmul.mubr.f32.gmra.mxu1 %v981_v45 }
 0x219   :  { %v1824_v24 = vpop.f32.mrf.mxu1 }
 0x21a   :  { %v1087_v46 = vadd.f32 %v1824_v24, %v2698_v28 }
 0x21b   :  { %v1081_v61 = vpop.f32.mrf.mxu1 }
 0x21c   :  { %v1082_v4 = vadd.f32 %v2698_v28, %v1081_v61  ;;  %v2705_v35 = vsel %vm1242_vm0, %v1087_v46, -1e+30 }
 0x21d   :  { %1277 = vmax.xlane.f32.xlu0 %v2705_v35 }
 0x21e   :  { %v2710_v41 = vsel %vm1242_vm0, %v1082_v4, -1e+30 }
 0x21f   :  { %1275 = vmax.xlane.f32.xlu1 %v2710_v41 }
 0x222   :  { %v1777_v38 = vpop.f32.mrf.mxu0 }
 0x223   :  { %v917_v5 = vadd.f32 %v1777_v38, %v2629_v19 }
 0x224   :  { %v911_v42 = vpop.f32.mrf.mxu0 }
 0x225   :  { %v912_v40 = vadd.f32 %v2629_v19, %v911_v42  ;;  %v983_v39 = vmax.f32 %v917_v5, 0.0 }
 0x227   :  { %v982_v34 = vmax.f32 %v912_v40, 0.0 }
 0x229   :  { %1855 = vmatprep.mubr.f32.mxu1 %v982_v34 }
 0x22a   :  { %1856 = vmatmul.mubr.f32.gmra.mxu1 %v983_v39 }
 0x235   :  { %v1780_v20 = vpop.f32.mrf.mxu0 }
 0x236   :  { %v927_v6 = vadd.f32 %v1780_v20, %v2629_v19 }
 0x237   :  { %v921_v52 = vpop.f32.mrf.mxu0 }
 0x238   :  { %v922_v8 = vadd.f32 %v2629_v19, %v921_v52  ;;  %v985_v10 = vmax.f32 %v927_v6, 0.0 }
 0x23a   :  { %v984_v9 = vmax.f32 %v922_v8, 0.0 }
 0x23c   :  { %1858 = vmatprep.mubr.f32.mxu1 %v984_v9 }
 0x23d   :  { %1859 = vmatmul.mubr.f32.gmra.mxu1 %v985_v10 }
 0x248   :  { %v1783_v11 = vpop.f32.mrf.mxu0 }
 0x249   :  { %v937_v51 = vadd.f32 %v1783_v11, %v2629_v19 }
 0x24a   :  { %v931_v62 = vpop.f32.mrf.mxu0 }
 0x24b   :  { %v932_v3 = vadd.f32 %v2629_v19, %v931_v62  ;;  %v987_v53 = vmax.f32 %v937_v51, 0.0 }
 0x24d   :  { %v986_v12 = vmax.f32 %v932_v3, 0.0 }
 0x24f   :  { %1861 = vmatprep.mubr.f32.mxu1 %v986_v12 }
 0x250   :  { %1862 = vmatmul.mubr.f32.gmra.mxu1 %v987_v53 }
 0x259   :  { %v1827_v15 = vpop.f32.mrf.mxu1 }
 0x25a   :  { %v1097_v16 = vadd.f32 %v1827_v15, %v2698_v28 }
 0x25b   :  { %v1786_v30 = vpop.f32.mrf.mxu0  ;;  %v1091_v2 = vpop.f32.mrf.mxu1 }
 0x25c   :  { %v1092_v59 = vadd.f32 %v2698_v28, %v1091_v2  ;;  %v2723_v21 = vsel %vm1242_vm0, %v1097_v16, -1e+30  ;;  %v947_v33 = vadd.f32 %v1786_v30, %v2629_v19 }
 0x25d   :  { %1281 = vmax.xlane.f32.xlu0 %v2723_v21  ;;  %v941_v50 = vpop.f32.mrf.mxu0  ;;  %v1830_v43 = vpop.f32.mrf.mxu1 }
 0x25e   :  { %v942_v23 = vadd.f32 %v2629_v19, %v941_v50  ;;  %v1107_v14 = vadd.f32 %v1830_v43, %v2698_v28  ;;  %v2731_v27 = vsel %vm1242_vm0, %v1092_v59, -1e+30  ;;  %v989_v58 = vmax.f32 %v947_v33, 0.0 }
 0x25f   :  { %1279 = vmax.xlane.f32.xlu1 %v2731_v27  ;;  %v1101_v25 = vpop.f32.mrf.mxu1 }
 0x260   :  { %v988_v22 = vmax.f32 %v942_v23, 0.0  ;;  %v1102_v44 = vadd.f32 %v2698_v28, %v1101_v25  ;;  %v2737_v47 = vsel %vm1242_vm0, %v1107_v14, -1e+30 }
 0x261   :  { %1285 = vmax.xlane.f32.xlu0 %v2737_v47  ;;  %v1833_v37 = vpop.f32.mrf.mxu1 }
 0x262   :  { %v1117_v1 = vadd.f32 %v1833_v37, %v2698_v28  ;;  %1864 = vmatprep.mubr.f32.mxu1 %v988_v22  ;;  %v2743_v26 = vsel %vm1242_vm0, %v1102_v44, -1e+30 }
 0x263   :  { %1283 = vmax.xlane.f32.xlu1 %v2743_v26  ;;  %v1111_v48 = vpop.f32.mrf.mxu1  ;;  %1865 = vmatmul.mubr.f32.gmra.mxu1 %v989_v58 }
 0x264   :  { %v1112_v18 = vadd.f32 %v2698_v28, %v1111_v48  ;;  %v2749_v13 = vsel %vm1242_vm0, %v1117_v1, -1e+30 }
 0x265   :  { %1289 = vmax.xlane.f32.xlu0 %v2749_v13  ;;  %v1836_v17 = vpop.f32.mrf.mxu1 }
 0x266   :  { %v1127_v32 = vadd.f32 %v1836_v17, %v2698_v28  ;;  %v1789_v49 = vpop.f32.mrf.mxu0  ;;  %v2755_v54 = vsel %vm1242_vm0, %v1112_v18, -1e+30 }
 0x267   :  { %1287 = vmax.xlane.f32.xlu1 %v2755_v54  ;;  %v1121_v7 = vpop.f32.mrf.mxu1  ;;  %v957_v55 = vadd.f32 %v1789_v49, %v2629_v19 }
 0x268   :  { %v1122_v57 = vadd.f32 %v2698_v28, %v1121_v7  ;;  %v951_v56 = vpop.f32.mrf.mxu0  ;;  %v2762_v31 = vsel %vm1242_vm0, %v1127_v32, -1e+30 }
 0x269   :  { %v952_v36 = vadd.f32 %v2629_v19, %v951_v56  ;;  %1293 = vmax.xlane.f32.xlu0 %v2762_v31  ;;  %v991_v0 = vmax.f32 %v957_v55, 0.0 }
 0x26a   :  { %v2768_v60 = vsel %vm1242_vm0, %v1122_v57, -1e+30 }
 0x26b   :  { %v990_v63 = vmax.f32 %v952_v36, 0.0  ;;  %1291 = vmax.xlane.f32.xlu1 %v2768_v60 }
 0x26d   :  { %1867 = vmatprep.mubr.f32.mxu1 %v990_v63 }
 0x26e   :  { %1868 = vmatmul.mubr.f32.gmra.mxu1 %v991_v0 }
 0x278   :  { %v1839_v45 = vpop.f32.mrf.mxu1 }
 0x279   :  { %v1137_v24 = vadd.f32 %v1839_v45, %v2698_v28 }
 0x27a   :  { %v1131_v46 = vpop.f32.mrf.mxu1 }
 0x27b   :  { %v1132_v61 = vadd.f32 %v2698_v28, %v1131_v46  ;;  %v2775_v19 = vsel %vm1242_vm0, %v1137_v24, -1e+30 }
 0x27c   :  { %1297 = vmax.xlane.f32.xlu0 %v2775_v19 }
 0x27d   :  { %v2780_v4 = vsel %vm1242_vm0, %v1132_v61, -1e+30 }
 0x27e   :  { %1295 = vmax.xlane.f32.xlu1 %v2780_v4 }
 0x28b   :  { %v1842_v38 = vpop.f32.mrf.mxu1 }
 0x28c   :  { %v1147_v5 = vadd.f32 %v1842_v38, %v2698_v28 }
 0x28d   :  { %v1141_v42 = vpop.f32.mrf.mxu1 }
 0x28e   :  { %v1142_v40 = vadd.f32 %v2698_v28, %v1141_v42  ;;  %v2787_v34 = vsel %vm1242_vm0, %v1147_v5, -1e+30 }
 0x28f   :  { %1301 = vmax.xlane.f32.xlu0 %v2787_v34 }
 0x290   :  { %v2792_v39 = vsel %vm1242_vm0, %v1142_v40, -1e+30 }
 0x291   :  { %1299 = vmax.xlane.f32.xlu1 %v2792_v39 }
 0x29e   :  { %v1845_v20 = vpop.f32.mrf.mxu1 }
 0x29f   :  { %v1157_v6 = vadd.f32 %v1845_v20, %v2698_v28 }
 0x2a0   :  { %v1151_v52 = vpop.f32.mrf.mxu1 }
 0x2a1   :  { %v1152_v8 = vadd.f32 %v2698_v28, %v1151_v52  ;;  %v2799_v9 = vsel %vm1242_vm0, %v1157_v6, -1e+30 }
 0x2a2   :  { %1305 = vmax.xlane.f32.xlu0 %v2799_v9 }
 0x2a3   :  { %v2804_v10 = vsel %vm1242_vm0, %v1152_v8, -1e+30 }
 0x2a4   :  { %1303 = vmax.xlane.f32.xlu1 %v2804_v10 }
 0x2a6   :  { %v1278_v46 = vpop.xlane.xlu0 %1277 }
 0x2a7   :  { %v1340_v42 = vsub.f32 %v2705_v35, %v1278_v46 }
 0x2a8   :  { %v1276_v61 = vpop.xlane.xlu1 %1275 }
 0x2a9   :  { %v1339_v20 = vsub.f32 %v2710_v41, %v1276_v61  ;;  %v1373_v8 = vmul.f32 1.442695, %v1340_v42 }
 0x2ab   :  { %1926 = vpow2.f32 %v1373_v8 }
 0x2b1   :  { %v1848_v11 = vpop.f32.mrf.mxu1 }
 0x2b2   :  { %v1167_v51 = vadd.f32 %v1848_v11, %v2698_v28 }
 0x2b3   :  { %v1161_v62 = vpop.f32.mrf.mxu1 }
 0x2b4   :  { %v1162_v3 = vadd.f32 %v2698_v28, %v1161_v62  ;;  %v2811_v12 = vsel %vm1242_vm0, %v1167_v51, -1e+30 }
 0x2b5   :  { %1309 = vmax.xlane.f32.xlu0 %v2811_v12 }
 0x2b6   :  { %v2816_v53 = vsel %vm1242_vm0, %v1162_v3, -1e+30  ;;  %v1371_v3 = vmul.f32 1.442695, %v1339_v20 }
 0x2b7   :  { %1307 = vmax.xlane.f32.xlu1 %v2816_v53 }
 0x2b8   :  { %1928 = vpow2.f32 %v1371_v3 }
 0x2c4   :  { %v1851_v15 = vpop.f32.mrf.mxu1 }
 0x2c5   :  { %v1177_v16 = vadd.f32 %v1851_v15, %v2698_v28 }
 0x2c6   :  { %v1171_v30 = vpop.f32.mrf.mxu1 }
 0x2c7   :  { %v1172_v2 = vadd.f32 %v2698_v28, %v1171_v30  ;;  %v2823_v59 = vsel %vm1242_vm0, %v1177_v16, -1e+30 }
 0x2c8   :  { %1313 = vmax.xlane.f32.xlu0 %v2823_v59 }
 0x2c9   :  { %v2828_v33 = vsel %vm1242_vm0, %v1172_v2, -1e+30 }
 0x2ca   :  { %1311 = vmax.xlane.f32.xlu1 %v2828_v33 }
 0x2d7   :  { %v1854_v50 = vpop.f32.mrf.mxu1 }
 0x2d8   :  { %v1187_v43 = vadd.f32 %v1854_v50, %v2698_v28 }
 0x2d9   :  { %v1181_v23 = vpop.f32.mrf.mxu1 }
 0x2da   :  { %v1182_v14 = vadd.f32 %v2698_v28, %v1181_v23  ;;  %v2835_v25 = vsel %vm1242_vm0, %v1187_v43, -1e+30 }
 0x2db   :  { %1317 = vmax.xlane.f32.xlu0 %v2835_v25 }
 0x2dc   :  { %v2840_v22 = vsel %vm1242_vm0, %v1182_v14, -1e+30 }
 0x2dd   :  { %1315 = vmax.xlane.f32.xlu1 %v2840_v22 }
 0x2e6   :  { %v1282_v38 = vpop.xlane.xlu0 %1281 }
 0x2e7   :  { %v1342_v11 = vsub.f32 %v2723_v21, %v1282_v38 }
 0x2e8   :  { %v1280_v5 = vpop.xlane.xlu1 %1279 }
 0x2e9   :  { %v1341_v15 = vsub.f32 %v2731_v27, %v1280_v5  ;;  %v1377_v41 = vmul.f32 1.442695, %v1342_v11 }
 0x2ea   :  { %v1857_v44 = vpop.f32.mrf.mxu1  ;;  %v1286_v40 = vpop.xlane.xlu0 %1285 }
 0x2eb   :  { %v1197_v58 = vadd.f32 %v1857_v44, %v2698_v28  ;;  %v1344_v2 = vsub.f32 %v2737_v47, %v1286_v40  ;;  %v1375_v27 = vmul.f32 1.442695, %v1341_v15  ;;  %1930 = vpow2.f32 %v1377_v41 }
 0x2ec   :  { %v1191_v37 = vpop.f32.mrf.mxu1  ;;  %v1284_v6 = vpop.xlane.xlu1 %1283 }
 0x2ed   :  { %v1192_v1 = vadd.f32 %v2698_v28, %v1191_v37  ;;  %v2847_v48 = vsel %vm1242_vm0, %v1197_v58, -1e+30  ;;  %v1343_v43 = vsub.f32 %v2743_v26, %v1284_v6  ;;  %v1381_v23 = vmul.f32 1.442695, %v1344_v2 }
 0x2ee   :  { %1321 = vmax.xlane.f32.xlu0 %v2847_v48  ;;  %v1290_v35 = vpop.xlane.xlu0 %1289  ;;  %1932 = vpow2.f32 %v1375_v27 }
 0x2ef   :  { %v2852_v18 = vsel %vm1242_vm0, %v1192_v1, -1e+30  ;;  %v1346_v14 = vsub.f32 %v2749_v13, %v1290_v35  ;;  %v1379_v58 = vmul.f32 1.442695, %v1343_v43  ;;  %1934 = vpow2.f32 %v1381_v23 }
 0x2f0   :  { %1319 = vmax.xlane.f32.xlu1 %v2852_v18  ;;  %v1288_v50 = vpop.xlane.xlu1 %1287 }
 0x2f1   :  { %v1345_v47 = vsub.f32 %v2755_v54, %v1288_v50  ;;  %1936 = vpow2.f32 %v1379_v58 }
 0x2f2   :  { %v1294_v44 = vpop.xlane.xlu0 %1293 }
 0x2f4   :  { %v1292_v1 = vpop.xlane.xlu1 %1291 }
 0x2f5   :  { %v1347_v54 = vsub.f32 %v2768_v60, %v1292_v1 }
 0x2f7   :  { %v1387_v38 = vmul.f32 1.442695, %v1347_v54 }
 0x2fd   :  { %v1860_v17 = vpop.f32.mrf.mxu1 }
 0x2fe   :  { %v1207_v32 = vadd.f32 %v1860_v17, %v2698_v28 }
 0x2ff   :  { %v1201_v49 = vpop.f32.mrf.mxu1 }
 0x300   :  { %v1202_v7 = vadd.f32 %v2698_v28, %v1201_v49  ;;  %v2859_v55 = vsel %vm1242_vm0, %v1207_v32, -1e+30  ;;  %v1385_v32 = vmul.f32 1.442695, %v1346_v14  ;;  %v1348_v49 = vsub.f32 %v2762_v31, %v1294_v44 }
 0x301   :  { %1325 = vmax.xlane.f32.xlu0 %v2859_v55 }
 0x302   :  { %v2864_v57 = vsel %vm1242_vm0, %v1202_v7, -1e+30  ;;  %1938 = vpow2.f32 %v1385_v32  ;;  %v1389_v31 = vmul.f32 1.442695, %v1348_v49 }
 0x303   :  { %1323 = vmax.xlane.f32.xlu1 %v2864_v57 }
 0x310   :  { %v1863_v56 = vpop.f32.mrf.mxu1 }
 0x311   :  { %v1217_v36 = vadd.f32 %v1863_v56, %v2698_v28  ;;  %v1298_v56 = vpop.xlane.xlu0 %1297 }
 0x312   :  { %v1211_v63 = vpop.f32.mrf.mxu1  ;;  %v1350_v46 = vsub.f32 %v2775_v19, %v1298_v56 }
 0x313   :  { %v1212_v0 = vadd.f32 %v2698_v28, %v1211_v63  ;;  %v2871_v45 = vsel %vm1242_vm0, %v1217_v36, -1e+30  ;;  %v1383_v36 = vmul.f32 1.442695, %v1345_v47  ;;  %v1296_v63 = vpop.xlane.xlu1 %1295 }
 0x314   :  { %1329 = vmax.xlane.f32.xlu0 %v2871_v45  ;;  %v1349_v60 = vsub.f32 %v2780_v4, %v1296_v63  ;;  %v1393_v42 = vmul.f32 1.442695, %v1350_v46 }
 0x315   :  { %v2876_v24 = vsel %vm1242_vm0, %v1212_v0, -1e+30  ;;  %1940 = vpow2.f32 %v1383_v36 }
 0x316   :  { %1327 = vmax.xlane.f32.xlu1 %v2876_v24  ;;  %1942 = vpow2.f32 %v1389_v31  ;;  %v1391_v6 = vmul.f32 1.442695, %v1349_v60 }
 0x317   :  { %1944 = vpow2.f32 %v1387_v38 }
 0x318   :  { %v1302_v61 = vpop.xlane.xlu0 %1301  ;;  %1946 = vpow2.f32 %v1393_v42 }
 0x319   :  { %v1352_v40 = vsub.f32 %v2787_v34, %v1302_v61  ;;  %1948 = vpow2.f32 %v1391_v6 }
 0x31a   :  { %v1300_v29 = vpop.xlane.xlu1 %1299 }
 0x31b   :  { %v1397_v11 = vmul.f32 1.442695, %v1352_v40 }
 0x31d   :  { %1950 = vpow2.f32 %v1397_v11 }
 0x323   :  { %v1866_v52 = vpop.f32.mrf.mxu1 }
 0x324   :  { %v1227_v51 = vadd.f32 %v1866_v52, %v2698_v28  ;;  %v1351_v52 = vsub.f32 %v2792_v39, %v1300_v29 }
 0x325   :  { %v1221_v62 = vpop.f32.mrf.mxu1 }
 0x326   :  { %v1222_v16 = vadd.f32 %v2698_v28, %v1221_v62  ;;  %v2887_v30 = vsel %vm1242_vm0, %v1227_v51, -1e+30  ;;  %v1395_v62 = vmul.f32 1.442695, %v1351_v52 }
 0x327   :  { %1333 = vmax.xlane.f32.xlu0 %v2887_v30 }
 0x328   :  { %v2893_v21 = vsel %vm1242_vm0, %v1222_v16, -1e+30  ;;  %1952 = vpow2.f32 %v1395_v62 }
 0x329   :  { %1331 = vmax.xlane.f32.xlu1 %v2893_v21 }
 0x32b   :  { %v1306_v20 = vpop.xlane.xlu0 %1305 }
 0x32c   :  { %v1354_v51 = vsub.f32 %v2799_v9, %v1306_v20 }
 0x32d   :  { %v1304_v8 = vpop.xlane.xlu1 %1303 }
 0x32e   :  { %v1869_v37 = vpop.f32.mrf.mxu1  ;;  %v1353_v3 = vsub.f32 %v2804_v10, %v1304_v8  ;;  %v1401_v16 = vmul.f32 1.442695, %v1354_v51 }
 0x32f   :  { %v1237_v17 = vadd.f32 %v1869_v37, %v2698_v28 }
 0x330   :  { %v1231_v7 = vpop.f32.mrf.mxu1  ;;  %v1399_v2 = vmul.f32 1.442695, %v1353_v3  ;;  %1954 = vpow2.f32 %v1401_v16 }
 0x331   :  { %v1232_v26 = vadd.f32 %v2698_v28, %v1231_v7  ;;  %v2904_v13 = vsel %vm1242_vm0, %v1237_v17, -1e+30  ;;  %v2914_v28 = vpop.eup %1926 }
 0x332   :  { %1337 = vmax.xlane.f32.xlu0 %v2904_v13  ;;  %v2918_v5 = vpop.eup %1928  ;;  %1956 = vpow2.f32 %v1399_v2 }
 0x333   :  { %v2910_v0 = vsel %vm1242_vm0, %v1232_v26, -1e+30  ;;  %v2922_v19 = vpop.eup %1930 }
 0x334   :  { %1335 = vmax.xlane.f32.xlu1 %v2910_v0  ;;  %v2926_v4 = vpop.eup %1932 }
 0x335   :  { %v2930_v34 = vpop.eup %1934 }
 0x336   :  { %1437 = vadd.xlane.f32.xlu0 %v2914_v28  ;;  %v2934_v15 = vpop.eup %1936 }
 0x337   :  { %v2938_v9 = vpop.eup %1938 }
 0x338   :  { %1435 = vadd.xlane.f32.xlu1 %v2918_v5  ;;  %v2942_v10 = vpop.eup %1940 }
 0x339   :  { %v2945_v43 = vpop.eup %1942 }
 0x33a   :  { %1441 = vadd.xlane.f32.xlu0 %v2922_v19  ;;  %v2948_v23 = vpop.eup %1944 }
 0x33c   :  { %1439 = vadd.xlane.f32.xlu1 %v2926_v4 }
 0x33e   :  { %1445 = vadd.xlane.f32.xlu0 %v2930_v34  ;;  %v1310_v39 = vpop.xlane.xlu0 %1309 }
 0x33f   :  { %v1356_v35 = vsub.f32 %v2811_v12, %v1310_v39 }
 0x340   :  { %v1308_v41 = vpop.xlane.xlu1 %1307  ;;  %1443 = vadd.xlane.f32.xlu1 %v2934_v15 }
 0x341   :  { %v1355_v50 = vsub.f32 %v2816_v53, %v1308_v41  ;;  %v1405_v27 = vmul.f32 1.442695, %v1356_v35  ;;  %v2951_v53 = vpop.eup %1946 }
 0x342   :  { %1449 = vadd.xlane.f32.xlu0 %v2938_v9  ;;  %v2954_v14 = vpop.eup %1948 }
 0x343   :  { %v1403_v12 = vmul.f32 1.442695, %v1355_v50  ;;  %1958 = vpow2.f32 %v1405_v27  ;;  %v2957_v44 = vpop.eup %1950 }
 0x344   :  { %1447 = vadd.xlane.f32.xlu1 %v2942_v10  ;;  %v2960_v58 = vpop.eup %1952 }
 0x345   :  { %1960 = vpow2.f32 %v1403_v12  ;;  %v2963_v47 = vpop.eup %1954 }
 0x346   :  { %1453 = vadd.xlane.f32.xlu0 %v2945_v43  ;;  %v2967_v17 = vpop.eup %1956 }
 0x348   :  { %1451 = vadd.xlane.f32.xlu1 %v2948_v23 }
 0x34a   :  { %1457 = vadd.xlane.f32.xlu0 %v2951_v53 }
 0x34c   :  { %1455 = vadd.xlane.f32.xlu1 %v2954_v14 }
 0x34e   :  { %1461 = vadd.xlane.f32.xlu0 %v2957_v44 }
 0x350   :  { %1459 = vadd.xlane.f32.xlu1 %v2960_v58  ;;  %v2971_v56 = vpop.eup %1958 }
 0x351   :  { %v1314_v37 = vpop.xlane.xlu0 %1313 }
 0x352   :  { %v1358_v1 = vsub.f32 %v2823_v59, %v1314_v37  ;;  %1465 = vadd.xlane.f32.xlu0 %v2963_v47  ;;  %v2974_v36 = vpop.eup %1960 }
 0x353   :  { %v1312_v32 = vpop.xlane.xlu1 %1311 }
 0x354   :  { %v1409_v49 = vmul.f32 1.442695, %v1358_v1  ;;  %v1357_v7 = vsub.f32 %v2828_v33, %v1312_v32  ;;  %1463 = vadd.xlane.f32.xlu1 %v2967_v17 }
 0x356   :  { %1962 = vpow2.f32 %v1409_v49  ;;  %v1407_v26 = vmul.f32 1.442695, %v1357_v7  ;;  %1469 = vadd.xlane.f32.xlu0 %v2971_v56 }
 0x358   :  { %1964 = vpow2.f32 %v1407_v26  ;;  %1467 = vadd.xlane.f32.xlu1 %v2974_v36 }
 0x363   :  { %v2977_v59 = vpop.eup %1962 }
 0x364   :  { %1473 = vadd.xlane.f32.xlu0 %v2977_v59  ;;  %v1318_v54 = vpop.xlane.xlu0 %1317 }
 0x365   :  { %v2980_v63 = vpop.eup %1964  ;;  %v1360_v33 = vsub.f32 %v2835_v25, %v1318_v54 }
 0x366   :  { %v1316_v31 = vpop.xlane.xlu1 %1315  ;;  %1471 = vadd.xlane.f32.xlu1 %v2980_v63 }
 0x367   :  { %v1413_v46 = vmul.f32 1.442695, %v1360_v33  ;;  %v1359_v61 = vsub.f32 %v2840_v22, %v1316_v31 }
 0x369   :  { %1966 = vpow2.f32 %v1413_v46  ;;  %v1411_v38 = vmul.f32 1.442695, %v1359_v61 }
 0x36b   :  { %1968 = vpow2.f32 %v1411_v38 }
 0x376   :  { %v2985_v60 = vpop.eup %1966 }
 0x377   :  { %1477 = vadd.xlane.f32.xlu0 %v2985_v60  ;;  %v1322_v42 = vpop.xlane.xlu0 %1321 }
 0x378   :  { %v2988_v29 = vpop.eup %1968  ;;  %v1362_v40 = vsub.f32 %v2847_v48, %v1322_v42 }
 0x379   :  { %v1320_v20 = vpop.xlane.xlu1 %1319  ;;  %1475 = vadd.xlane.f32.xlu1 %v2988_v29 }
 0x37a   :  { %v1361_v25 = vsub.f32 %v2852_v18, %v1320_v20  ;;  %v1417_v6 = vmul.f32 1.442695, %v1362_v40 }
 0x37c   :  { %v1415_v52 = vmul.f32 1.442695, %v1361_v25  ;;  %1970 = vpow2.f32 %v1417_v6 }
 0x37e   :  { %1972 = vpow2.f32 %v1415_v52 }
 0x389   :  { %v2993_v22 = vpop.eup %1970 }
 0x38a   :  { %v1326_v8 = vpop.xlane.xlu0 %1325  ;;  %1481 = vadd.xlane.f32.xlu0 %v2993_v22 }
 0x38b   :  { %v2995_v11 = vpop.eup %1972  ;;  %v1364_v51 = vsub.f32 %v2859_v55, %v1326_v8 }
 0x38c   :  { %v1324_v62 = vpop.xlane.xlu1 %1323  ;;  %1479 = vadd.xlane.f32.xlu1 %v2995_v11 }
 0x38d   :  { %v1421_v48 = vmul.f32 1.442695, %v1364_v51  ;;  %v1363_v3 = vsub.f32 %v2864_v57, %v1324_v62 }
 0x38f   :  { %1974 = vpow2.f32 %v1421_v48  ;;  %v1419_v18 = vmul.f32 1.442695, %v1363_v3 }
 0x391   :  { %1976 = vpow2.f32 %v1419_v18 }
 0x39c   :  { %v3001_v39 = vpop.eup %1974 }
 0x39d   :  { %1485 = vadd.xlane.f32.xlu0 %v3001_v39  ;;  %v1330_v16 = vpop.xlane.xlu0 %1329 }
 0x39e   :  { %v3004_v35 = vpop.eup %1976  ;;  %v1366_v41 = vsub.f32 %v2871_v45, %v1330_v16 }
 0x39f   :  { %v1328_v2 = vpop.xlane.xlu1 %1327  ;;  %1483 = vadd.xlane.f32.xlu1 %v3004_v35 }
 0x3a0   :  { %v1425_v55 = vmul.f32 1.442695, %v1366_v41  ;;  %v1365_v50 = vsub.f32 %v2876_v24, %v1328_v2 }
 0x3a2   :  { %1978 = vpow2.f32 %v1425_v55  ;;  %v1423_v57 = vmul.f32 1.442695, %v1365_v50 }
 0x3a4   :  { %1980 = vpow2.f32 %v1423_v57 }
 0x3af   :  { %v3009_v27 = vpop.eup %1978 }
 0x3b0   :  { %1489 = vadd.xlane.f32.xlu0 %v3009_v27  ;;  %v1334_v12 = vpop.xlane.xlu0 %1333 }
 0x3b1   :  { %v3012_v37 = vpop.eup %1980  ;;  %v1368_v1 = vsub.f32 %v2887_v30, %v1334_v12 }
 0x3b2   :  { %v1332_v32 = vpop.xlane.xlu1 %1331  ;;  %1487 = vadd.xlane.f32.xlu1 %v3012_v37 }
 0x3b3   :  { %v1429_v45 = vmul.f32 1.442695, %v1368_v1  ;;  %v1367_v49 = vsub.f32 %v2893_v21, %v1332_v32 }
 0x3b5   :  { %1982 = vpow2.f32 %v1429_v45  ;;  %v1427_v24 = vmul.f32 1.442695, %v1367_v49 }
 0x3b7   :  { %1984 = vpow2.f32 %v1427_v24 }
 0x3bb   :  { %v1338_v7 = vpop.xlane.xlu0 %1337 }
 0x3bc   :  { %v1370_v26 = vsub.f32 %v2904_v13, %v1338_v7 }
 0x3bd   :  { %v1336_v54 = vpop.xlane.xlu1 %1335 }
 0x3be   :  { %v1433_v33 = vmul.f32 1.442695, %v1370_v26  ;;  %v1369_v31 = vsub.f32 %v2910_v0, %v1336_v54 }
 0x3bf   :  { %v1438_v46 = vpop.xlane.xlu0 %1437 }
 0x3c0   :  { %1986 = vpow2.f32 %v1433_v33  ;;  %v1431_v61 = vmul.f32 1.442695, %v1369_v31 }
 0x3c1   :  { %1988 = vrcp.f32 %v1438_v46  ;;  %v1436_v30 = vpop.xlane.xlu1 %1435 }
 0x3c2   :  { %v3019_v38 = vpop.eup %1982  ;;  %1990 = vpow2.f32 %v1431_v61 }
 0x3c3   :  { %1992 = vrcp.f32 %v1436_v30  ;;  %1493 = vadd.xlane.f32.xlu0 %v3019_v38  ;;  %v1442_v21 = vpop.xlane.xlu0 %1441 }
 0x3c4   :  { %v3022_v42 = vpop.eup %1984  ;;  %1994 = vrcp.f32 %v1442_v21 }
 0x3c5   :  { %1491 = vadd.xlane.f32.xlu1 %v3022_v42  ;;  %v1440_v13 = vpop.xlane.xlu1 %1439 }
 0x3c6   :  { %1996 = vrcp.f32 %v1440_v13 }
 0x3c7   :  { %v1446_v0 = vpop.xlane.xlu0 %1445 }
 0x3c8   :  { %1998 = vrcp.f32 %v1446_v0 }
 0x3c9   :  { %v1444_v40 = vpop.xlane.xlu1 %1443 }
 0x3ca   :  { %2000 = vrcp.f32 %v1444_v40 }
 0x3cb   :  { %v1450_v20 = vpop.xlane.xlu0 %1449 }
 0x3cc   :  { %2002 = vrcp.f32 %v1450_v20 }
 0x3cd   :  { %v3025_v25 = vpop.eup %1986  ;;  %v1448_v6 = vpop.xlane.xlu1 %1447 }
 0x3ce   :  { %v1989_v52 = vpop.eup %1988  ;;  %2004 = vrcp.f32 %v1448_v6  ;;  %1497 = vadd.xlane.f32.xlu0 %v3025_v25 }
 0x3cf   :  { %v3028_v8 = vpop.eup %1990  ;;  %v1502_v51 = vmul.f32 %v1989_v52, %v2914_v28  ;;  %v1454_v62 = vpop.xlane.xlu0 %1453 }
 0x3d0   :  { %v1993_v48 = vpop.eup %1992  ;;  %2006 = vrcp.f32 %v1454_v62  ;;  %1495 = vadd.xlane.f32.xlu1 %v3028_v8 }
 0x3d1   :  { %v1995_v3 = vpop.eup %1994  ;;  %1564 = vst [vmem:[#allocation2 + $0x8] sm:$0xff] %v1502_v51  ;;  %v1500_v18 = vmul.f32 %v1993_v48, %v2918_v5  ;;  %v1452_v16 = vpop.xlane.xlu1 %1451 }
 0x3d2   :  { %v1506_v41 = vmul.f32 %v1995_v3, %v2922_v19  ;;  %2008 = vrcp.f32 %v1452_v16 }
 0x3d3   :  { %v1997_v2 = vpop.eup %1996  ;;  %1563 = vst [vmem:[#allocation2] sm:$0xff] %v1500_v18  ;;  %v1458_v55 = vpop.xlane.xlu0 %1457 }
 0x3d4   :  { %1566 = vst [vmem:[#allocation2 + $0x18] sm:$0xff] %v1506_v41  ;;  %v1504_v50 = vmul.f32 %v1997_v2, %v2926_v4  ;;  %2010 = vrcp.f32 %v1458_v55 }
 0x3d5   :  { %v1999_v28 = vpop.eup %1998  ;;  %v1456_v57 = vpop.xlane.xlu1 %1455 }
 0x3d6   :  { %1565 = vst [vmem:[#allocation2 + $0x10] sm:$0xff] %v1504_v50  ;;  %v1510_v12 = vmul.f32 %v1999_v28, %v2930_v34  ;;  %2012 = vrcp.f32 %v1456_v57 }
 0x3d7   :  { %v2001_v1 = vpop.eup %2000  ;;  %v1462_v32 = vpop.xlane.xlu0 %1461 }
 0x3d8   :  { %1568 = vst [vmem:[#allocation2 + $0x28] sm:$0xff] %v1510_v12  ;;  %v1508_v5 = vmul.f32 %v2001_v1, %v2934_v15  ;;  %2014 = vrcp.f32 %v1462_v32 }
 0x3d9   :  { %v2003_v19 = vpop.eup %2002  ;;  %v1460_v45 = vpop.xlane.xlu1 %1459 }
 0x3da   :  { %1567 = vst [vmem:[#allocation2 + $0x20] sm:$0xff] %v1508_v5  ;;  %v1514_v49 = vmul.f32 %v2003_v19, %v2938_v9  ;;  %2016 = vrcp.f32 %v1460_v45 }
 0x3db   :  { %v2005_v4 = vpop.eup %2004  ;;  %v1466_v24 = vpop.xlane.xlu0 %1465 }
 0x3dc   :  { %1570 = vst [vmem:[#allocation2 + $0x38] sm:$0xff] %v1514_v49  ;;  %v1512_v7 = vmul.f32 %v2005_v4, %v2942_v10  ;;  %2018 = vrcp.f32 %v1466_v24 }
 0x3dd   :  { %v2007_v34 = vpop.eup %2006  ;;  %v1464_v26 = vpop.xlane.xlu1 %1463 }
 0x3de   :  { %1569 = vst [vmem:[#allocation2 + $0x30] sm:$0xff] %v1512_v7  ;;  %v1518_v54 = vmul.f32 %v2007_v34, %v2945_v43  ;;  %2020 = vrcp.f32 %v1464_v26 }
 0x3df   :  { %v2009_v15 = vpop.eup %2008  ;;  %v1470_v33 = vpop.xlane.xlu0 %1469 }
 0x3e0   :  { %1572 = vst [vmem:[#allocation2 + $0x48] sm:$0xff] %v1518_v54  ;;  %v1516_v31 = vmul.f32 %v2009_v15, %v2948_v23  ;;  %2022 = vrcp.f32 %v1470_v33 }
 0x3e1   :  { %v2011_v9 = vpop.eup %2010  ;;  %v1468_v46 = vpop.xlane.xlu1 %1467 }
 0x3e2   :  { %1571 = vst [vmem:[#allocation2 + $0x40] sm:$0xff] %v1516_v31  ;;  %v1522_v61 = vmul.f32 %v2011_v9, %v2951_v53  ;;  %2024 = vrcp.f32 %v1468_v46 }
 0x3e3   :  { %v2013_v10 = vpop.eup %2012 }
 0x3e4   :  { %1574 = vst [vmem:[#allocation2 + $0x58] sm:$0xff] %v1522_v61  ;;  %v1520_v30 = vmul.f32 %v2013_v10, %v2954_v14 }
 0x3e5   :  { %v2015_v21 = vpop.eup %2014 }
 0x3e6   :  { %1573 = vst [vmem:[#allocation2 + $0x50] sm:$0xff] %v1520_v30  ;;  %v1526_v43 = vmul.f32 %v2015_v21, %v2957_v44 }
 0x3e7   :  { %v2017_v13 = vpop.eup %2016 }
 0x3e8   :  { %1576 = vst [vmem:[#allocation2 + $0x68] sm:$0xff] %v1526_v43  ;;  %v1524_v0 = vmul.f32 %v2017_v13, %v2960_v58 }
 0x3e9   :  { %v2019_v23 = vpop.eup %2018 }
 0x3ea   :  { %1575 = vst [vmem:[#allocation2 + $0x60] sm:$0xff] %v1524_v0  ;;  %v1530_v40 = vmul.f32 %v2019_v23, %v2963_v47 }
 0x3eb   :  { %v2021_v20 = vpop.eup %2020 }
 0x3ec   :  { %1578 = vst [vmem:[#allocation2 + $0x78] sm:$0xff] %v1530_v40  ;;  %v1528_v53 = vmul.f32 %v2021_v20, %v2967_v17 }
 0x3ed   :  { %v2023_v6 = vpop.eup %2022  ;;  %v1474_v52 = vpop.xlane.xlu0 %1473 }
 0x3ee   :  { %1577 = vst [vmem:[#allocation2 + $0x70] sm:$0xff] %v1528_v53  ;;  %v1534_v14 = vmul.f32 %v2023_v6, %v2971_v56  ;;  %2026 = vrcp.f32 %v1474_v52 }
 0x3ef   :  { %v2025_v51 = vpop.eup %2024  ;;  %v1472_v44 = vpop.xlane.xlu1 %1471 }
 0x3f0   :  { %1580 = vst [vmem:[#allocation2 + $0x88] sm:$0xff] %v1534_v14  ;;  %v1532_v62 = vmul.f32 %v2025_v51, %v2974_v36  ;;  %2028 = vrcp.f32 %v1472_v44 }
 0x3f2   :  { %1579 = vst [vmem:[#allocation2 + $0x80] sm:$0xff] %v1532_v62 }
 0x3fb   :  { %v2027_v58 = vpop.eup %2026 }
 0x3fc   :  { %v1538_v47 = vmul.f32 %v2027_v58, %v2977_v59 }
 0x3fd   :  { %v2029_v48 = vpop.eup %2028 }
 0x3fe   :  { %1582 = vst [vmem:[#allocation2 + $0x98] sm:$0xff] %v1538_v47  ;;  %v1536_v17 = vmul.f32 %v2029_v48, %v2980_v63 }
 0x400   :  { %1581 = vst [vmem:[#allocation2 + $0x90] sm:$0xff] %v1536_v17  ;;  %v1478_v3 = vpop.xlane.xlu0 %1477 }
 0x401   :  { %2030 = vrcp.f32 %v1478_v3 }
 0x402   :  { %v1476_v18 = vpop.xlane.xlu1 %1475 }
 0x403   :  { %2032 = vrcp.f32 %v1476_v18 }
 0x40e   :  { %v2031_v56 = vpop.eup %2030 }
 0x40f   :  { %v1542_v16 = vmul.f32 %v2031_v56, %v2985_v60 }
 0x410   :  { %v2033_v41 = vpop.eup %2032 }
 0x411   :  { %1584 = vst [vmem:[#allocation2 + $0xa8] sm:$0xff] %v1542_v16  ;;  %v1540_v36 = vmul.f32 %v2033_v41, %v2988_v29 }
 0x413   :  { %1583 = vst [vmem:[#allocation2 + $0xa0] sm:$0xff] %v1540_v36  ;;  %v1482_v2 = vpop.xlane.xlu0 %1481 }
 0x414   :  { %2034 = vrcp.f32 %v1482_v2 }
 0x415   :  { %v1480_v59 = vpop.xlane.xlu1 %1479 }
 0x416   :  { %2036 = vrcp.f32 %v1480_v59 }
 0x421   :  { %v2035_v55 = vpop.eup %2034 }
 0x422   :  { %v1546_v63 = vmul.f32 %v2035_v55, %v2993_v22 }
 0x423   :  { %v2037_v50 = vpop.eup %2036 }
 0x424   :  { %v1544_v28 = vmul.f32 %v2037_v50, %v2995_v11  ;;  %1586 = vst [vmem:[#allocation2 + $0xb8] sm:$0xff] %v1546_v63 }
 0x426   :  { %1585 = vst [vmem:[#allocation2 + $0xb0] sm:$0xff] %v1544_v28  ;;  %v1486_v57 = vpop.xlane.xlu0 %1485 }
 0x427   :  { %2038 = vrcp.f32 %v1486_v57 }
 0x428   :  { %v1484_v60 = vpop.xlane.xlu1 %1483 }
 0x429   :  { %2040 = vrcp.f32 %v1484_v60 }
 0x434   :  { %v2039_v12 = vpop.eup %2038 }
 0x435   :  { %v1550_v29 = vmul.f32 %v2039_v12, %v3001_v39 }
 0x436   :  { %v2041_v1 = vpop.eup %2040 }
 0x437   :  { %1588 = vst [vmem:[#allocation2 + $0xc8] sm:$0xff] %v1550_v29  ;;  %v1548_v32 = vmul.f32 %v2041_v1, %v3004_v35 }
 0x439   :  { %1587 = vst [vmem:[#allocation2 + $0xc0] sm:$0xff] %v1548_v32  ;;  %v1490_v5 = vpop.xlane.xlu0 %1489 }
 0x43a   :  { %2042 = vrcp.f32 %v1490_v5 }
 0x43b   :  { %v1488_v19 = vpop.xlane.xlu1 %1487 }
 0x43c   :  { %2044 = vrcp.f32 %v1488_v19 }
 0x447   :  { %v2043_v22 = vpop.eup %2042 }
 0x448   :  { %v1554_v11 = vmul.f32 %v2043_v22, %v3009_v27 }
 0x449   :  { %v2045_v45 = vpop.eup %2044 }
 0x44a   :  { %1590 = vst [vmem:[#allocation2 + $0xd8] sm:$0xff] %v1554_v11  ;;  %v1552_v49 = vmul.f32 %v2045_v45, %v3012_v37 }
 0x44c   :  { %1589 = vst [vmem:[#allocation2 + $0xd0] sm:$0xff] %v1552_v49  ;;  %v1494_v4 = vpop.xlane.xlu0 %1493 }
 0x44d   :  { %2046 = vrcp.f32 %v1494_v4 }
 0x44e   :  { %v1492_v39 = vpop.xlane.xlu1 %1491 }
 0x44f   :  { %2048 = vrcp.f32 %v1492_v39 }
 0x457   :  { %v1498_v24 = vpop.xlane.xlu0 %1497 }
 0x458   :  { %2050 = vrcp.f32 %v1498_v24 }
 0x459   :  { %v1496_v35 = vpop.xlane.xlu1 %1495 }
 0x45a   :  { %v2047_v7 = vpop.eup %2046  ;;  %2052 = vrcp.f32 %v1496_v35 }
 0x45b   :  { %v1558_v34 = vmul.f32 %v2047_v7, %v3019_v38 }
 0x45c   :  { %v2049_v26 = vpop.eup %2048 }
 0x45d   :  { %1592 = vst [vmem:[#allocation2 + $0xe8] sm:$0xff] %v1558_v34  ;;  %v1556_v27 = vmul.f32 %v2049_v26, %v3022_v42 }
 0x45f   :  { %1591 = vst [vmem:[#allocation2 + $0xe0] sm:$0xff] %v1556_v27 }
 0x465   :  { %v2051_v54 = vpop.eup %2050 }
 0x466   :  { %v1562_v37 = vmul.f32 %v2051_v54, %v3025_v25 }
 0x467   :  { %v2053_v15 = vpop.eup %2052 }
 0x468   :  { %1594 = vst [vmem:[#allocation2 + $0xf8] sm:$0xff] %v1562_v37  ;;  %v1560_v33 = vmul.f32 %v2053_v15, %v3028_v8 }
 0x46a   :  { %1593 = vst [vmem:[#allocation2 + $0xf0] sm:$0xff] %v1560_v33 }
 0x46b   :  { %2065 = shalt.err (!%p2062_p4)
}
 0x46c   :  { %s2080_s29 = smov 128   ;;  %s2081_s30 = smov 8  }
 0x46d   :  { %1606 = dma.vmem_to_hbm [thread:$0]  %s1601_s3, 4096, %s3072_s6, [#allocation3], %s2080_s29, %s2080_s29, %s2081_s30  }
 0x46e   :  { %2074 = dma.done.wait [#allocation3], 4096  }
 0x46f   :  { %2075 = vsyncadd [#allocation3], 4294963200 }
 0x470   :  { %1610 = vsyncpa [#allocation3], 1 }

</bundles_post_ra>
